<compile_context>
chip_gen: v7x
topology: tpu7x:2x2x1
jax: 0.10.0
libtpu: 0.0.40
codegen_flags: <defaults>
</compile_context>

<pallas_src>
import math
from functools import partial

import jax
import jax.numpy as jnp
from jax.experimental import pallas as pl
from jax.experimental.pallas import tpu as pltpu

BN_EPS = 1e-5
BN_SCALE = 1.0 / math.sqrt(1.0 + BN_EPS)  # eval-mode BN: gamma=1, beta=0, mean=0, var=1
VMEM_LIMIT = 32 * 1024 * 1024
K_FULL_MAX = 2048   # single full-K block up to this K
K_TILE = 512        # K tile (multiple of 256 for v6e/v7x MXU) beyond that
ASPP_RATES = (2, 4, 8)

# TODO(synk): BatchNorm is applied in inference form (default running stats) and
# ASPP's Dropout(0.5) as identity; torch train-mode batch-stats / dropout RNG are
# not reproduced.


def _rup(x, m):
    return (x + m - 1) // m * m


def _pick_tm(M, bytes_per_row, budget, cap=512, align=16, min_steps=2):
    """Largest row tile <= cap whose resident slab fits `budget` bytes.

    Forces at least `min_steps` grid steps (when M is big enough) so the
    "parallel" M axis can be sharded across both v7x TensorCores.
    """
    t = min(cap, max(align, budget // max(bytes_per_row, 1)))
    t = max(align, (t // align) * align)
    nsteps = -(-M // t)
    if M > min_steps * align:
        nsteps = max(nsteps, min_steps)
    t = -(-M // nsteps)
    return max(align, _rup(t, align))


def _pad_rows(a, pr):
    if pr == 0:
        return a
    return jnp.pad(a, [(0, pr)] + [(0, 0)] * (a.ndim - 1))


def _pad2(a, pr, pc):
    if pr == 0 and pc == 0:
        return a
    return jnp.pad(a, ((0, pr), (0, pc)))


def _pad_axis1(a, p):
    if p == 0:
        return a
    return jnp.pad(a, ((0, 0), (0, p), (0, 0)))


# ----------------------------------------------------------------------------
# Pallas kernel 1: GEMM with fused per-column affine (BN) + optional ReLU6.
#   bf16 operands on the MXU, f32 scratch accumulation, bf16 output.
# ----------------------------------------------------------------------------
def _mm_kernel(x_ref, w_ref, s_ref, b_ref, o_ref, acc_ref, *, act):
    k = pl.program_id(1)

    @pl.when(k == 0)
    def _():
        acc_ref[...] = jnp.zeros_like(acc_ref)

    acc_ref[...] += jnp.dot(x_ref[...], w_ref[...],
                            preferred_element_type=jnp.float32)

    @pl.when(k == pl.num_programs(1) - 1)
    def _():
        y = acc_ref[...] * s_ref[...] + b_ref[...]
        if act == "relu6":
            y = jnp.clip(y, 0.0, 6.0)
        o_ref[...] = y.astype(o_ref.dtype)


@partial(jax.jit, static_argnames=("act", "out_dtype"))
def matmul_affine_act(x, w, scale, shift, act="none", out_dtype=jnp.bfloat16):
    """(M,K)@(K,N) * scale + shift (per column), optional ReLU6."""
    M, K = x.shape
    N = w.shape[1]
    if K <= K_FULL_MAX:
        tk, Kp = K, K                      # full-K block, single K step
    else:
        tk = K_TILE
        Kp = _rup(K, tk)
    # size the M tile against the *resident* slab (x tile + acc + out rows)
    tm = _pick_tm(M, tk * 2 + N * 6, budget=2 << 20, cap=512, align=16)
    Mp = _rup(M, tm)
    xp = _pad2(x.astype(jnp.bfloat16), Mp - M, Kp - K)
    wp = _pad2(w.astype(jnp.bfloat16), Kp - K, 0)
    sp = scale.astype(jnp.float32).reshape(1, N)
    bp = shift.astype(jnp.float32).reshape(1, N)
    out = pl.pallas_call(
        partial(_mm_kernel, act=act),
        out_shape=jax.ShapeDtypeStruct((Mp, N), out_dtype),
        grid_spec=pltpu.PrefetchScalarGridSpec(
            num_scalar_prefetch=0,
            grid=(Mp // tm, Kp // tk),
            in_specs=[
                pl.BlockSpec((tm, tk), lambda i, k: (i, k)),
                pl.BlockSpec((tk, N), lambda i, k: (k, 0)),
                pl.BlockSpec((1, N), lambda i, k: (0, 0)),
                pl.BlockSpec((1, N), lambda i, k: (0, 0)),
            ],
            out_specs=pl.BlockSpec((tm, N), lambda i, k: (i, 0)),
            scratch_shapes=[pltpu.VMEM((tm, N), jnp.float32)],
        ),
        compiler_params=pltpu.CompilerParams(
            dimension_semantics=("parallel", "arbitrary"),
            vmem_limit_bytes=VMEM_LIMIT),
    )(xp, wp, sp, bp)
    return out[:M]


# ----------------------------------------------------------------------------
# Pallas kernel 2: fused InvertedResidual tail
#   3x3 depthwise (+BN+ReLU6)  ->  1x1 project GEMM (+BN)  ->  optional residual
#   Patches arrive tap-leading (KK, M, C) in bf16; hidden stays in VMEM.
# ----------------------------------------------------------------------------
def _dw_proj_kernel(*refs, kk, has_res):
    if has_res:
        (p_ref, dw_ref, ds_ref, db_ref, pw_ref, ps_ref, pb_ref,
         res_ref, o_ref) = refs
    else:
        p_ref, dw_ref, ds_ref, db_ref, pw_ref, ps_ref, pb_ref, o_ref = refs
        res_ref = None
    dw = dw_ref[...]                                         # (KK, Ch) f32
    acc = p_ref[0].astype(jnp.float32) * dw[0:1, :]
    for k in range(1, kk):
        acc = acc + p_ref[k].astype(jnp.float32) * dw[k:k + 1, :]
    h = jnp.clip(acc * ds_ref[...] + db_ref[...], 0.0, 6.0)  # dw BN + ReLU6
    y = jnp.dot(h.astype(jnp.bfloat16), pw_ref[...],
                preferred_element_type=jnp.float32)          # 1x1 project (MXU)
    y = y * ps_ref[...] + pb_ref[...]
    if has_res:
        y = y + res_ref[...].astype(jnp.float32)
    o_ref[...] = y.astype(o_ref.dtype)


@jax.jit
def dw_project_fused(patches, dw_w, dw_scale, dw_shift, pw, p_scale, p_shift,
                     residual=None):
    """patches (KK,M,Ch), dw_w (KK,Ch), pw (Ch,Co) -> (M,Co) bf16."""
    KK, M, Ch = patches.shape
    Co = pw.shape[1]
    has_res = residual is not None
    bytes_row = KK * Ch * 2 + Co * (8 if has_res else 6)
    tm = _pick_tm(M, bytes_row, budget=4 << 20, cap=512, align=16)
    Mp = _rup(M, tm)
    args = [_pad_axis1(patches.astype(jnp.bfloat16), Mp - M),
            dw_w.astype(jnp.float32),
            dw_scale.astype(jnp.float32).reshape(1, Ch),
            dw_shift.astype(jnp.float32).reshape(1, Ch),
            pw.astype(jnp.bfloat16),
            p_scale.astype(jnp.float32).reshape(1, Co),
            p_shift.astype(jnp.float32).reshape(1, Co)]
    in_specs = [
        pl.BlockSpec((KK, tm, Ch), lambda m: (0, m, 0)),
        pl.BlockSpec((KK, Ch), lambda m: (0, 0)),
        pl.BlockSpec((1, Ch), lambda m: (0, 0)),
        pl.BlockSpec((1, Ch), lambda m: (0, 0)),
        pl.BlockSpec((Ch, Co), lambda m: (0, 0)),
        pl.BlockSpec((1, Co), lambda m: (0, 0)),
        pl.BlockSpec((1, Co), lambda m: (0, 0)),
    ]
    if has_res:
        args.append(_pad_rows(residual.astype(jnp.bfloat16), Mp - M))
        in_specs.append(pl.BlockSpec((tm, Co), lambda m: (m, 0)))
    out = pl.pallas_call(
        partial(_dw_proj_kernel, kk=KK, has_res=has_res),
        out_shape=jax.ShapeDtypeStruct((Mp, Co), jnp.bfloat16),
        grid_spec=pltpu.PrefetchScalarGridSpec(
            num_scalar_prefetch=0,
            grid=(Mp // tm,),
            in_specs=in_specs,
            out_specs=pl.BlockSpec((tm, Co), lambda m: (m, 0)),
        ),
        compiler_params=pltpu.CompilerParams(
            dimension_semantics=("parallel",),
            vmem_limit_bytes=VMEM_LIMIT),
    )(*args)
    return out[:M]


# ----------------------------------------------------------------------------
# Pallas kernel 3: fused DepthwiseM2OIndexBlock core
#   4x (4x4-s2 depthwise + BN + ReLU6 + per-channel 1x1 grouped scale),
#   then sigmoid and softmax across the 4 maps -- one pass over the patches.
# ----------------------------------------------------------------------------
def _index_block_kernel(p_ref, w_ref, s_ref, b_ref, pw_ref, y_ref, z_ref, *, kk):
    w = w_ref[...]                                  # (4, KK, C) f32
    pw = pw_ref[...]                                # (4, C)
    s = s_ref[...]                                  # (1, C)
    b = b_ref[...]                                  # (1, C)
    p0 = p_ref[0].astype(jnp.float32)
    accs = [p0 * w[j, 0:1, :] for j in range(4)]
    for k in range(1, kk):
        pk = p_ref[k].astype(jnp.float32)
        for j in range(4):
            accs[j] = accs[j] + pk * w[j, k:k + 1, :]
    ys, es = [], []
    for j in range(4):
        m = jnp.clip(accs[j] * s + b, 0.0, 6.0) * pw[j:j + 1, :]
        yj = pl.reciprocal(1.0 + jnp.exp(-m), approx=True)   # sigmoid via EUP
        ys.append(yj)
        es.append(jnp.exp(yj))
    inv = pl.reciprocal(es[0] + es[1] + es[2] + es[3], approx=True)
    for j in range(4):
        y_ref[j, :, :] = ys[j].astype(y_ref.dtype)
        z_ref[j, :, :] = (es[j] * inv).astype(z_ref.dtype)


@jax.jit
def index_block_fused(patches, w4, scale, shift, pw4):
    """patches (KK,M,C), w4 (4,KK,C), pw4 (4,C) -> (sigmoid, softmax) (4,M,C)."""
    KK, M, C = patches.shape
    bytes_row = KK * C * 2 + 8 * C * 2
    tm = _pick_tm(M, bytes_row, budget=4 << 20, cap=512, align=16)
    Mp = _rup(M, tm)
    pp = _pad_axis1(patches.astype(jnp.bfloat16), Mp - M)
    sp = scale.astype(jnp.float32).reshape(1, C)
    bp = shift.astype(jnp.float32).reshape(1, C)
    y, z = pl.pallas_call(
        partial(_index_block_kernel, kk=KK),
        out_shape=(jax.ShapeDtypeStruct((4, Mp, C), jnp.bfloat16),
                   jax.ShapeDtypeStruct((4, Mp, C), jnp.bfloat16)),
        grid_spec=pltpu.PrefetchScalarGridSpec(
            num_scalar_prefetch=0,
            grid=(Mp // tm,),
            in_specs=[
                pl.BlockSpec((KK, tm, C), lambda m: (0, m, 0)),
                pl.BlockSpec((4, KK, C), lambda m: (0, 0, 0)),
                pl.BlockSpec((1, C), lambda m: (0, 0)),
                pl.BlockSpec((1, C), lambda m: (0, 0)),
                pl.BlockSpec((4, C), lambda m: (0, 0)),
            ],
            out_specs=(pl.BlockSpec((4, tm, C), lambda m: (0, m, 0)),
                       pl.BlockSpec((4, tm, C), lambda m: (0, m, 0))),
        ),
        compiler_params=pltpu.CompilerParams(
            dimension_semantics=("parallel",),
            vmem_limit_bytes=VMEM_LIMIT),
    )(pp, w4.astype(jnp.float32), sp, bp, pw4.astype(jnp.float32))
    return y[:, :M], z[:, :M]


# ----------------------------------------------------------------------------
# Pallas kernel 4: single-output-channel conv (the two pred convs, N=1)
#   VPU multiply + lane reduction; keeps the N=1 GEMMs off the MXU.
# ----------------------------------------------------------------------------
def _colsum_kernel(x_ref, w_ref, o_ref, *, act, scale, shift):
    y = jnp.sum(x_ref[...].astype(jnp.float32) * w_ref[...],
                axis=-1, keepdims=True)
    y = y * scale + shift
    if act == "relu6":
        y = jnp.clip(y, 0.0, 6.0)
    o_ref[...] = y.astype(o_ref.dtype)


@partial(jax.jit, static_argnames=("act", "scale", "shift"))
def reduce_to_single_channel(x, w, act="none", scale=1.0, shift=0.0):
    M, K = x.shape
    tm = _pick_tm(M, K * 2 + 8, budget=4 << 20, cap=512, align=16)
    Mp = _rup(M, tm)
    xp = _pad_rows(x.astype(jnp.bfloat16), Mp - M)
    out = pl.pallas_call(
        partial(_colsum_kernel, act=act, scale=scale, shift=shift),
        out_shape=jax.ShapeDtypeStruct((Mp, 1), jnp.float32),
        grid_spec=pltpu.PrefetchScalarGridSpec(
            num_scalar_prefetch=0,
            grid=(Mp // tm,),
            in_specs=[pl.BlockSpec((tm, K), lambda m: (m, 0)),
                      pl.BlockSpec((1, K), lambda m: (0, 0))],
            out_specs=pl.BlockSpec((tm, 1), lambda m: (m, 0)),
        ),
        compiler_params=pltpu.CompilerParams(
            dimension_semantics=("parallel",),
            vmem_limit_bytes=VMEM_LIMIT),
    )(xp, w.astype(jnp.float32).reshape(1, K))
    return out[:M]


# ----------------------------------------------------------------------------
# Glue: patch extraction, conv wrappers, pooling, upsampling, pixel shuffle
# ----------------------------------------------------------------------------
# TODO(synk): halo-tiled in-kernel tap extraction for the 5x5 decoder convs and
# the 3x3/4x4 depthwise windows is left for a follow-up; im2col patch tensors
# are still materialized in HBM (now in bf16 with the tap axis leading).
def extract_patches(x, kh, kw, stride=1, padding=0, dilation=1,
                    taps_leading=False):
    """x: (B,H,W,C) -> patch tensor, Ho, Wo.  Pure data movement.

    taps_leading=False: (B,Ho,Wo,kh*kw,C) for im2col GEMM.
    taps_leading=True : (kh*kw,B,Ho,Wo,C) for the depthwise/index kernels.
    """
    B, H, W, C = x.shape
    if padding > 0:
        x = jnp.pad(x, ((0, 0), (padding, padding), (padding, padding), (0, 0)))
    Hp, Wp = H + 2 * padding, W + 2 * padding
    Ho = (Hp - (dilation * (kh - 1) + 1)) // stride + 1
    Wo = (Wp - (dilation * (kw - 1) + 1)) // stride + 1
    taps = []
    for i in range(kh):
        for j in range(kw):
            sl = x[:, i * dilation: i * dilation + stride * (Ho - 1) + 1: stride,
                      j * dilation: j * dilation + stride * (Wo - 1) + 1: stride, :]
            taps.append(sl)
    axis = 0 if taps_leading else 3
    return jnp.stack(taps, axis=axis), Ho, Wo


def conv_std(x, w, scale, shift, act="none", stride=1, padding=0, dilation=1):
    kh, kw, cin, cout = w.shape
    B, H, W, _ = x.shape
    if kh == 1 and kw == 1 and stride == 1 and padding == 0 and dilation == 1:
        # 1x1 conv: no patch extraction, just a reshape into the GEMM.
        y = matmul_affine_act(x.reshape(B * H * W, cin), w.reshape(cin, cout),
                              scale, shift, act=act)
        return y.reshape(B, H, W, cout)
    patches, Ho, Wo = extract_patches(x.astype(jnp.bfloat16), kh, kw, stride,
                                      padding, dilation)
    y = matmul_affine_act(patches.reshape(B * Ho * Wo, kh * kw * cin),
                          w.reshape(kh * kw * cin, cout), scale, shift, act=act)
    return y.reshape(B, Ho, Wo, cout)


def conv_to_1(x, w, act, scale, shift, padding):
    kh, kw, cin, _ = w.shape
    B = x.shape[0]
    patches, Ho, Wo = extract_patches(x.astype(jnp.bfloat16), kh, kw, 1,
                                      padding, 1)
    y = reduce_to_single_channel(patches.reshape(B * Ho * Wo, kh * kw * cin),
                                 w.reshape(kh * kw * cin),
                                 act=act, scale=scale, shift=shift)
    return y.reshape(B, Ho, Wo, 1)


def bn_vec(c):
    return jnp.full((c,), BN_SCALE, jnp.float32), jnp.zeros((c,), jnp.float32)


def avg_pool2x2_times4(x):            # 4 * F.avg_pool2d(x, (2,2), stride=2)
    B, H, W, C = x.shape
    return 4.0 * x.reshape(B, H // 2, 2, W // 2, 2, C).mean(axis=(2, 4))


def upsample_nearest2x(x):            # F.interpolate(mode='nearest') with 2x size
    return jnp.repeat(jnp.repeat(x, 2, axis=1), 2, axis=2)


def pixel_shuffle_maps(m):
    # m: (4, B, h2, w2, C), map index k = di*2 + dj  ->  (B, 2*h2, 2*w2, C)
    _, B, h2, w2, C = m.shape
    m = m.reshape(2, 2, B, h2, w2, C).transpose(2, 3, 0, 4, 1, 5)
    return m.reshape(B, 2 * h2, 2 * w2, C)


# ----------------------------------------------------------------------------
# Deterministic parameter construction (arrays only -> whole forward is jit-able)
# ----------------------------------------------------------------------------
class ParamGen:
    def __init__(self, seed=42):
        self.key = jax.random.PRNGKey(seed)

    def _next(self):
        self.key, sub = jax.random.split(self.key)
        return sub

    def conv(self, kh, kw, cin, cout):        # He init (matches encoder init rule)
        std = math.sqrt(2.0 / (kh * kw * cout))
        return std * jax.random.normal(self._next(), (kh, kw, cin, cout), jnp.float32)

    def dwconv(self, kh, kw, c):
        std = math.sqrt(2.0 / (kh * kw * c))
        return std * jax.random.normal(self._next(), (kh, kw, c), jnp.float32)

    def chan_scale(self, c):                  # 1x1 depthwise conv == per-channel scale
        std = math.sqrt(2.0 / c)
        return std * jax.random.normal(self._next(), (c,), jnp.float32)


# After the stride-rewrite loop in IndexMattingEncoder.__init__, every
# InvertedResidual runs with stride=1 and dilation=1; downsampling is done by
# 4*avg_pool2d between stages.
LAYER_SETTINGS = {
    "layer1": [(32, 16, 1)],
    "layer2": [(16, 24, 6), (24, 24, 6)],
    "layer3": [(24, 32, 6), (32, 32, 6), (32, 32, 6)],
    "layer4": [(32, 64, 6), (64, 64, 6), (64, 64, 6), (64, 64, 6)],
    "layer5": [(64, 96, 6), (96, 96, 6), (96, 96, 6)],
    "layer6": [(96, 160, 6), (160, 160, 6), (160, 160, 6)],
    "layer7": [(160, 320, 6)],
}


def make_ir(pg, inp, oup, t):
    hidden = int(round(inp * t))
    p = {}
    if t != 1:
        p["pw1"] = pg.conv(1, 1, inp, hidden)
    p["dw"] = pg.dwconv(3, 3, hidden)
    p["pw2"] = pg.conv(1, 1, hidden, oup)
    return p


def apply_ir(p, x):
    B, H, W, inp = x.shape
    hidden = p["dw"].shape[-1]
    oup = p["pw2"].shape[-1]
    if "pw1" in p:                                        # expand_ratio != 1
        s, b = bn_vec(hidden)
        h = conv_std(x, p["pw1"], s, b, "relu6")          # 1x1 expand on UNPADDED x
    else:
        h = x.astype(jnp.bfloat16)
    # fixed_padding(kernel=3, dilation=1): symmetric pad of 1.  Applying it after
    # the 1x1 expand is exact: zero pixels stay zero through the zero-bias conv,
    # zero-shift BN and ReLU6.
    h = jnp.pad(h, ((0, 0), (1, 1), (1, 1), (0, 0)))
    patches, Ho, Wo = extract_patches(h, 3, 3, 1, 0, 1, taps_leading=True)
    ds, db = bn_vec(hidden)
    ps, pb = bn_vec(oup)
    res = x.reshape(B * H * W, inp) if inp == oup else None
    y = dw_project_fused(patches.reshape(9, B * Ho * Wo, hidden),
                         p["dw"].reshape(9, hidden), ds, db,
                         p["pw2"].reshape(hidden, oup), ps, pb, res)
    return y.reshape(B, Ho, Wo, oup)


# TODO(synk): DepthwiseM2OIndexBlock / ASPP / IndexedUpsamlping / hlconv are not
# in the prompt; they are reconstructed from the reference IndexNet implementation.
def make_index_block(pg, c):
    return {"dw": [pg.dwconv(4, 4, c) for _ in range(4)],
            "pw": [pg.chan_scale(c) for _ in range(4)]}


def apply_index_block(p, x):
    B, H, W, C = x.shape
    patches, Ho, Wo = extract_patches(x.astype(jnp.bfloat16), 4, 4, stride=2,
                                      padding=1, taps_leading=True)
    s, b = bn_vec(C)
    w4 = jnp.stack(p["dw"], axis=0).reshape(4, 16, C)
    pw4 = jnp.stack(p["pw"], axis=0)                         # (4, C)
    y, z = index_block_fused(patches.reshape(16, B * Ho * Wo, C), w4, s, b, pw4)
    y = y.reshape(4, B, Ho, Wo, C)
    z = z.reshape(4, B, Ho, Wo, C)
    idx_en = pixel_shuffle_maps(z)      # softmax(sigmoid) -> encoder index
    idx_de = pixel_shuffle_maps(y)      # sigmoid          -> decoder index
    return idx_en, idx_de


def make_aspp(pg, inp=320, oup=160, mid=256):
    return {"b0": pg.conv(1, 1, inp, mid),
            "br": [pg.conv(3, 3, inp, mid) for _ in ASPP_RATES],
            "pool": pg.conv(1, 1, inp, mid),
            "proj": pg.conv(1, 1, mid * (len(ASPP_RATES) + 2), oup)}


def apply_aspp(p, x):
    mid = p["b0"].shape[-1]
    oup = p["proj"].shape[-1]
    s, b = bn_vec(mid)
    outs = [conv_std(x, p["b0"], s, b, "relu6")]
    for w, r in zip(p["br"], ASPP_RATES):
        outs.append(conv_std(x, w, s, b, "relu6", padding=r, dilation=r))
    g = jnp.mean(x, axis=(1, 2), keepdims=True)                # global avg pool
    g = conv_std(g, p["pool"], s, b, "relu6")
    outs.append(jnp.broadcast_to(g, (x.shape[0], x.shape[1], x.shape[2], mid)))
    cat = jnp.concatenate(outs, axis=-1)
    so, bo = bn_vec(oup)
    return conv_std(cat, p["proj"], so, bo, "relu6")           # dropout: identity (eval)


def make_dec(pg, inp, oup, k=5):
    return {"w": pg.conv(k, k, inp, oup)}


def apply_dec(p, l_enc, l_low, idx=None):
    k = p["w"].shape[0]
    oup = p["w"].shape[-1]
    if idx is not None:
        l_enc = idx * upsample_nearest2x(l_enc)
    cat = jnp.concatenate([l_enc.astype(jnp.bfloat16),
                           l_low.astype(jnp.bfloat16)], axis=-1)
    s, b = bn_vec(oup)
    return conv_std(cat, p["w"], s, b, "relu6", padding=k // 2)


def build_params(seed=42):
    pg = ParamGen(seed)
    P = {"layer0": pg.conv(3, 3, 4, 32)}        # stride patched to 1 by _stride()
    for name, cfg in LAYER_SETTINGS.items():
        P[name] = [make_ir(pg, i, o, t) for (i, o, t) in cfg]
    for name, c in [("index0", 32), ("index2", 24), ("index3", 32),
                    ("index4", 64), ("index6", 160)]:
        P[name] = make_index_block(pg, c)
    P["aspp"] = make_aspp(pg)
    for name, i, o in [("d6", 320, 96), ("d5", 192, 64), ("d4", 128, 32),
                       ("d3", 64, 24), ("d2", 48, 16), ("d1", 32, 32),
                       ("d0", 64, 32)]:
        P[name] = make_dec(pg, i, o)
    P["pred1"] = pg.conv(5, 5, 32, 1)
    P["pred2"] = pg.conv(5, 5, 1, 1)
    return P


# ----------------------------------------------------------------------------
# Full forward pass (encoder + decoder), NCHW in / NCHW out
# ----------------------------------------------------------------------------
def index_matting_forward(P, x_nchw):
    x = jnp.transpose(x_nchw, (0, 2, 3, 1)).astype(jnp.float32)   # NCHW -> NHWC

    def run(name, v):
        for blk in P[name]:
            v = apply_ir(blk, v)
        return v

    # ---- encoder ----
    s, b = bn_vec(32)
    l0 = conv_std(x, P["layer0"], s, b, "relu6", stride=1, padding=1)
    idx0_en, idx0_de = apply_index_block(P["index0"], l0)
    l0 = idx0_en * l0
    l0p = avg_pool2x2_times4(l0)
    l1 = run("layer1", l0p)
    l2 = run("layer2", l1)
    idx2_en, idx2_de = apply_index_block(P["index2"], l2)
    l2 = idx2_en * l2
    l2p = avg_pool2x2_times4(l2)
    l3 = run("layer3", l2p)
    idx3_en, idx3_de = apply_index_block(P["index3"], l3)
    l3 = idx3_en * l3
    l3p = avg_pool2x2_times4(l3)
    l4 = run("layer4", l3p)
    idx4_en, idx4_de = apply_index_block(P["index4"], l4)
    l4 = idx4_en * l4
    l4p = avg_pool2x2_times4(l4)
    l5 = run("layer5", l4p)
    l6 = run("layer6", l5)
    idx6_en, idx6_de = apply_index_block(P["index6"], l6)
    l6 = idx6_en * l6
    l6p = avg_pool2x2_times4(l6)
    l7 = run("layer7", l6p)
    l = apply_aspp(P["aspp"], l7)

    # ---- decoder ----
    l = apply_dec(P["d6"], l, l6, idx6_de)
    l = apply_dec(P["d5"], l, l5)
    l = apply_dec(P["d4"], l, l4, idx4_de)
    l = apply_dec(P["d3"], l, l3, idx3_de)
    l = apply_dec(P["d2"], l, l2, idx2_de)
    l = apply_dec(P["d1"], l, l1)
    l = apply_dec(P["d0"], l, l0, idx0_de)

    # pred: conv_bn(32->1)+ReLU6, then a plain 5x5 conv (no bias)
    l = conv_to_1(l, P["pred1"], act="relu6", scale=BN_SCALE, shift=0.0, padding=2)
    l = conv_to_1(l, P["pred2"], act="none", scale=1.0, shift=0.0, padding=2)

    return jnp.transpose(l, (0, 3, 1, 2))                          # NHWC -> NCHW


if __name__ == "__main__":
    B, C, H, W = 2, 4, 32, 32        # RGB + trimap; H, W divisible by 32
    x = jax.random.normal(jax.random.PRNGKey(0), (B, C, H, W), jnp.float32)
    params = build_params(seed=42)
    fwd = jax.jit(index_matting_forward)
    out = jax.block_until_ready(fwd(params, x))
    assert out.shape == (B, 1, H, W), out.shape
    assert bool(jnp.all(jnp.isfinite(out)))
    print("KERNEL_OK")
</pallas_src>

<mosaic_0001>
module attributes {stable_mosaic.version = 11 : i64} {
  func.func @_mm_kernel(%arg0: i32, %arg1: i32, %arg2: memref<512x36xbf16, #tpu.memory_space<vmem>>, %arg3: memref<36x32xbf16, #tpu.memory_space<vmem>>, %arg4: memref<1x32xf32, #tpu.memory_space<vmem>>, %arg5: memref<1x32xf32, #tpu.memory_space<vmem>>, %arg6: memref<512x32xbf16, #tpu.memory_space<vmem>>, %arg7: memref<512x32xf32, #tpu.memory_space<vmem>>) attributes {dimension_semantics = [#tpu.dimension_semantics<parallel>, #tpu.dimension_semantics<arbitrary>], iteration_bounds = array<i64: 4, 1>, scalar_prefetch = 0 : i64, scratch_operands = 1 : i64, tpu.core_type = #tpu.core_type<tc>, window_params = [{transform_indices = @transform_0, window_bounds = array<i64: 512, 36>}, {transform_indices = @transform_1, window_bounds = array<i64: 36, 32>}, {pipeline_mode = #tpu.pipeline_mode<synchronous>, transform_indices = @transform_2, window_bounds = array<i64: 1, 32>}, {pipeline_mode = #tpu.pipeline_mode<synchronous>, transform_indices = @transform_3, window_bounds = array<i64: 1, 32>}, {transform_indices = @transform_4, window_bounds = array<i64: 512, 32>}]} {
    %c0_i32 = arith.constant 0 : i32
    %0 = arith.cmpi eq, %arg1, %c0_i32 : i32
    %1 = arith.extui %0 : i1 to i32
    %c0_i32_0 = arith.constant 0 : i32
    %2 = arith.cmpi ne, %1, %c0_i32_0 : i32
    scf.if %2 {
      %cst_10 = arith.constant 0.000000e+00 : f32
      %12 = vector.broadcast %cst_10 : f32 to vector<512x32xf32>
      %c0_11 = arith.constant 0 : index
      %c0_12 = arith.constant 0 : index
      %13 = vector.load %arg7[%c0_11, %c0_12] : memref<512x32xf32, #tpu.memory_space<vmem>>, vector<512x32xf32>
      tpu.vector_store %arg7[%c0_11, %c0_12], %12 {strides = array<i32>} : memref<512x32xf32, #tpu.memory_space<vmem>>, vector<512x32xf32>,
    } else {
    }
    %c0 = arith.constant 0 : index
    %c0_1 = arith.constant 0 : index
    %3 = vector.load %arg7[%c0, %c0_1] : memref<512x32xf32, #tpu.memory_space<vmem>>, vector<512x32xf32>
    %c0_2 = arith.constant 0 : index
    %c0_3 = arith.constant 0 : index
    %4 = vector.load %arg2[%c0_2, %c0_3] : memref<512x36xbf16, #tpu.memory_space<vmem>>, vector<512x36xbf16>
    %c0_4 = arith.constant 0 : index
    %c0_5 = arith.constant 0 : index
    %5 = vector.load %arg3[%c0_4, %c0_5] : memref<36x32xbf16, #tpu.memory_space<vmem>>, vector<36x32xbf16>
    %cst = arith.constant dense<0.000000e+00> : vector<512x32xf32>
    %6 = tpu.matmul %4, %5, %cst {dimension_numbers = #tpu.dot_dimension_numbers<[1], [0], [0], [1], [0, 0, 1, 1], [], []>} : vector<512x36xbf16>, vector<36x32xbf16>, vector<512x32xf32> -> vector<512x32xf32>
    %7 = arith.addf %3, %6 : vector<512x32xf32>
    %c0_6 = arith.constant 0 : index
    %c0_7 = arith.constant 0 : index
    %8 = vector.load %arg7[%c0_6, %c0_7] : memref<512x32xf32, #tpu.memory_space<vmem>>, vector<512x32xf32>
    tpu.vector_store %arg7[%c0_6, %c0_7], %7 {strides = array<i32>} : memref<512x32xf32, #tpu.memory_space<vmem>>, vector<512x32xf32>,
    %c0_i32_8 = arith.constant 0 : i32
    %9 = arith.cmpi eq, %arg1, %c0_i32_8 : i32
    %10 = arith.extui %9 : i1 to i32
    %c0_i32_9 = arith.constant 0 : i32
    %11 = arith.cmpi ne, %10, %c0_i32_9 : i32
    scf.if %11 {
      %c0_10 = arith.constant 0 : index
      %c0_11 = arith.constant 0 : index
      %12 = vector.load %arg7[%c0_10, %c0_11] : memref<512x32xf32, #tpu.memory_space<vmem>>, vector<512x32xf32>
      %c0_12 = arith.constant 0 : index
      %c0_13 = arith.constant 0 : index
      %13 = vector.load %arg4[%c0_12, %c0_13] : memref<1x32xf32, #tpu.memory_space<vmem>>, vector<1x32xf32>
      %14 = vector.broadcast %13 : vector<1x32xf32> to vector<512x32xf32>
      %15 = arith.mulf %12, %14 : vector<512x32xf32>
      %c0_14 = arith.constant 0 : index
      %c0_15 = arith.constant 0 : index
      %16 = vector.load %arg5[%c0_14, %c0_15] : memref<1x32xf32, #tpu.memory_space<vmem>>, vector<1x32xf32>
      %17 = vector.broadcast %16 : vector<1x32xf32> to vector<512x32xf32>
      %18 = arith.addf %15, %17 : vector<512x32xf32>
      %cst_16 = arith.constant 0.000000e+00 : f32
      %cst_17 = arith.constant 6.000000e+00 : f32
      %19 = vector.broadcast %cst_16 : f32 to vector<512x32xf32>
      %20 = arith.maximumf %19, %18 : vector<512x32xf32>
      %21 = vector.broadcast %cst_17 : f32 to vector<512x32xf32>
      %22 = arith.minimumf %21, %20 : vector<512x32xf32>
      %23 = arith.truncf %22 : vector<512x32xf32> to vector<512x32xbf16>
      %c0_18 = arith.constant 0 : index
      %c0_19 = arith.constant 0 : index
      %24 = vector.load %arg6[%c0_18, %c0_19] : memref<512x32xbf16, #tpu.memory_space<vmem>>, vector<512x32xbf16>
      tpu.vector_store %arg6[%c0_18, %c0_19], %23 {strides = array<i32>} : memref<512x32xbf16, #tpu.memory_space<vmem>>, vector<512x32xbf16>,
    } else {
    }
    return
  }
  func.func @transform_0(%arg0: i32, %arg1: i32) -> (i32, i32) {
    %c0_i32 = arith.constant 0 : i32
    return %arg0, %arg1 : i32, i32
  }
  func.func @transform_1(%arg0: i32, %arg1: i32) -> (i32, i32) {
    %c0_i32 = arith.constant 0 : i32
    %c0_i32_0 = arith.constant 0 : i32
    return %arg1, %c0_i32 : i32, i32
  }
  func.func @transform_2(%arg0: i32, %arg1: i32) -> (i32, i32) {
    %c0_i32 = arith.constant 0 : i32
    %c0_i32_0 = arith.constant 0 : i32
    %c0_i32_1 = arith.constant 0 : i32
    return %c0_i32, %c0_i32_0 : i32, i32
  }
  func.func @transform_3(%arg0: i32, %arg1: i32) -> (i32, i32) {
    %c0_i32 = arith.constant 0 : i32
    %c0_i32_0 = arith.constant 0 : i32
    %c0_i32_1 = arith.constant 0 : i32
    return %c0_i32, %c0_i32_0 : i32, i32
  }
  func.func @transform_4(%arg0: i32, %arg1: i32) -> (i32, i32) {
    %c0_i32 = arith.constant 0 : i32
    %c0_i32_0 = arith.constant 0 : i32
    return %arg0, %c0_i32 : i32, i32
  }
}

</mosaic_0001>

<bundles_post_ra>
// kernel: matmul_affine_act.1
= control target key start
LH: loop header
LB: loop body
LE: loop exit
PB: predicated region body
PF: predicated region fallthrough
CT: control target
= control target key end

     0   :  { %s2318_s15 = smov 0   ;;  %s2320_s16 = smov 0   ;;  %s3022_s0 = inlined_call_operand.vmem [shape: bf16[2048,36], index: 0, kind: input, shape index: {}]   ;;  %s3023_s1 = inlined_call_operand.vmem [shape: bf16[36,32], index: 1, kind: input, shape index: {}]   ;;  %s3024_s2 = inlined_call_operand.vmem [shape: f32[1,32], index: 2, kind: input, shape index: {}]   ;;  %s3025_s3 = inlined_call_operand.vmem [shape: f32[1,32], index: 3, kind: input, shape index: {}]   ;;  %s3026_s4 = inlined_call_operand.vmem [shape: bf16[2048,32], index: 4, kind: output, shape index: {}]  }
   0x1   :  { %s2322_s17 = smov 0  }
   0x2 LB: > { %s26_s18 = sadd.s32 1, %s2286_s16  ;;  %p1889_p0 = scmp.ge.s32.totalorder %s2290_s17, 1  ;;  %s2290_s17 = sphi %s2322_s17, %s14_s17   ;;  %s2286_s16 = sphi %s2320_s16, %s3028_s16   ;;  %s2282_s15 = sphi %s2318_s15, %s3027_s15  }
   0x3   : > { %p28_p1 = scmp.ge.s32.totalorder %s26_s18, 4  ;;  %p191_p2 = scmp.lt.s32.totalorder %s2290_s17, 5 }
   0x5   : > { %s3030_s18 = smov (%p28_p1, %s26_s18), 0  ;;  %p192_p3 = pnand %p1889_p0, %p191_p2 }
   0x6   : > { %v2231_v0 = vld [vmem:[%s3023_s1] sm:$0xff] (!%p192_p3)   ;;  %v2342_v1 = vld [vmem:[%s3023_s1 + $0x8] sm:$0xff] (!%p192_p3)   ;;  %s1890_s23 = sshll.u32 (!%p192_p3), %s2282_s15, 6  ;;  %vm251_vm0 = vcmask (!%p192_p3), 261120   ;;  %v2292_v3 = vmov (!%p192_p3), 0.0   ;;  %vm721_vm1 = vcmask (!%p192_p3), 1041408  }
   0x7   : > { %195 = sbr.rel (%p192_p3) target bundleno = 353 (0x161), region = 36  ;;  %2128 = vmatprep.subr.bf16.mxu0 (!%p192_p3), %v2231_v0  ;;  %2198 = vmatprep.subr.bf16.mxu1 (!%p192_p3), %v2231_v0  ;;  %p226_p4 = scmp.lt.s32.totalorder (!%p192_p3), %s1890_s23, 255  ;;  %v2349_v2 = vld [vmem:[%s3023_s1 + $0x10] ss:$0 sps:$4 sm:$0x33] (!%p192_p3)   ;;  %254 = vst.msk [vmem:[#allocation2 + $0x10] sm:$0xff] (!%p192_p3), %vm251_vm0, %v2292_v3 }
   0x8   : > { %2129 = vmatpush3.bf16.msra.mxu0 (!%p192_p3), %v2231_v0  ;;  %2201 = vmatpush3.bf16.msra.mxu1 (!%p192_p3), %v2231_v0  ;;  %252 = vst.msk [vmem:[#allocation2] sm:$0xff] (!%p192_p3), %vm251_vm0, %v2292_v3  ;;  %253 = vst.msk [vmem:[#allocation2 + $0x8] sm:$0xff] (!%p192_p3), %vm251_vm0, %v2292_v3  ;;  %vm624_vm2 = vcmask (!%p192_p3), 293888   ;;  %v723_v4 = vsel (!%p192_p3), %vm721_vm1, %v2349_v2, 0  ;;  %vm1736_vm3 = vcmask (!%p192_p3), 257024  }
   0x9   : > { %2130 = vmatprep.subr.bf16.mxu0 (!%p192_p3), %v2342_v1  ;;  %2199 = vmatprep.subr.bf16.mxu1 (!%p192_p3), %v2342_v1  ;;  %255 = vst.msk [vmem:[#allocation2 + $0x18] sm:$0xff] (!%p192_p3), %vm251_vm0, %v2292_v3  ;;  %256 = vst.msk [vmem:[#allocation2 + $0x20] sm:$0xff] (!%p192_p3), %vm251_vm0, %v2292_v3 }
   0xa   : > { %257 = vst.msk [vmem:[#allocation2 + $0x28] sm:$0xff] (!%p192_p3), %vm251_vm0, %v2292_v3  ;;  %258 = vst.msk [vmem:[#allocation2 + $0x30] sm:$0xff] (!%p192_p3), %vm251_vm0, %v2292_v3 }
   0xb   : > { %259 = vst.msk [vmem:[#allocation2 + $0x38] sm:$0xff] (!%p192_p3), %vm251_vm0, %v2292_v3  ;;  %260 = vst.msk [vmem:[#allocation2 + $0x40] sm:$0xff] (!%p192_p3), %vm251_vm0, %v2292_v3 }
   0xc   : > { %261 = vst.msk [vmem:[#allocation2 + $0x48] sm:$0xff] (!%p192_p3), %vm251_vm0, %v2292_v3  ;;  %262 = vst.msk [vmem:[#allocation2 + $0x50] sm:$0xff] (!%p192_p3), %vm251_vm0, %v2292_v3  ;;  %2131 = vmatpush3.bf16.msra.mxu0 (!%p192_p3), %v2342_v1  ;;  %2202 = vmatpush3.bf16.msra.mxu1 (!%p192_p3), %v2342_v1  ;;  %v2569_v1 = vld [vmem:[%s3024_s2] ss:$0 sm:$0xff] (!%p192_p3) }
   0xd   : > { %263 = vst.msk [vmem:[#allocation2 + $0x58] sm:$0xff] (!%p192_p3), %vm251_vm0, %v2292_v3  ;;  %264 = vst.msk [vmem:[#allocation2 + $0x60] sm:$0xff] (!%p192_p3), %vm251_vm0, %v2292_v3  ;;  %2204 = vmatprep.subr.msk.bf16.mxu0 (!%p192_p3), %vm721_vm1, %v2349_v2  ;;  %2205 = vmatprep.subr.msk.bf16.mxu1 (!%p192_p3), %vm721_vm1, %v2349_v2 }
   0xe   : > { %s3032_s23 = smov (!%p226_p4, %s1890_s23), 255  ;;  %265 = vst.msk [vmem:[#allocation2 + $0x68] sm:$0xff] %vm251_vm0, %v2292_v3  ;;  %266 = vst.msk [vmem:[#allocation2 + $0x70] sm:$0xff] %vm251_vm0, %v2292_v3  ;;  %v318_v37 = vld [vmem:[#allocation2 + $0x10] sm:$0xff] }
   0xf   : > { %267 = vst.msk [vmem:[#allocation2 + $0x78] sm:$0xff] %vm251_vm0, %v2292_v3  ;;  %268 = vst.msk [vmem:[#allocation2 + $0x80] sm:$0xff] %vm251_vm0, %v2292_v3  ;;  %s1891_s26 = sshll.u32 %s3032_s23, 2  ;;  %v316_v39 = vld [vmem:[#allocation2] sm:$0xff]  ;;  %v317_v49 = vld [vmem:[#allocation2 + $0x8] sm:$0xff] }
  0x10   : > { %269 = vst.msk [vmem:[#allocation2 + $0x88] sm:$0xff] %vm251_vm0, %v2292_v3  ;;  %270 = vst.msk [vmem:[#allocation2 + $0x90] sm:$0xff] %vm251_vm0, %v2292_v3  ;;  %s2489_s29 = scalar_lea.vmem %s3022_s0, %s1891_s26  ;;  %2133 = vmatpush3.bf16.msra.mxu0 %v723_v4  ;;  %2203 = vmatpush3.bf16.msra.mxu1 %v723_v4  ;;  %v319_v43 = vld [vmem:[#allocation2 + $0x18] sm:$0xff]  ;;  %v320_v63 = vld [vmem:[#allocation2 + $0x20] sm:$0xff]  ;;  %s2613_s10 = scalar_lea.vmem %s3026_s4, %s1891_s26 }
  0x11   : > { %271 = vst.msk [vmem:[#allocation2 + $0x98] sm:$0xff] %vm251_vm0, %v2292_v3  ;;  %272 = vst.msk [vmem:[#allocation2 + $0xa0] sm:$0xff] %vm251_vm0, %v2292_v3  ;;  %v2234_v5 = vld [vmem:[%s2489_s29] sm:$0xff]   ;;  %v2236_v7 = vld [vmem:[%s2489_s29 + $0x8] sm:$0xff]  }
  0x12   : > { %273 = vst.msk [vmem:[#allocation2 + $0xa8] sm:$0xff] %vm251_vm0, %v2292_v3  ;;  %274 = vst.msk [vmem:[#allocation2 + $0xb0] sm:$0xff] %vm251_vm0, %v2292_v3  ;;  %v2235_v6 = vld [vmem:[%s2489_s29 + $0x80] sm:$0xff]   ;;  %2134 = vmatprep.mubr.msk.bf16.mxu0 %vm624_vm2, %v2234_v5  ;;  %v2237_v8 = vld [vmem:[%s2489_s29 + $0x88] sm:$0xff]  }
  0x13   : > { %275 = vst.msk [vmem:[#allocation2 + $0xb8] sm:$0xff] %vm251_vm0, %v2292_v3  ;;  %276 = vst.msk [vmem:[#allocation2 + $0xc0] sm:$0xff] %vm251_vm0, %v2292_v3  ;;  %2166 = vmatprep.mubr.msk.bf16.mxu1 %vm624_vm2, %v2235_v6  ;;  %v2238_v9 = vld [vmem:[%s2489_s29 + $0x10] sm:$0xff]   ;;  %2135 = vmatmul.mubr.msk.bf16.vlgmr.msra.gmra.mrb[0].mxu0 %vm624_vm2, %v2236_v7  ;;  %v2240_v11 = vld [vmem:[%s2489_s29 + $0x18] sm:$0xff]  }
  0x14   : > { %277 = vst.msk [vmem:[#allocation2 + $0xc8] sm:$0xff] %vm251_vm0, %v2292_v3  ;;  %278 = vst.msk [vmem:[#allocation2 + $0xd0] sm:$0xff] %vm251_vm0, %v2292_v3  ;;  %v2239_v10 = vld [vmem:[%s2489_s29 + $0x90] sm:$0xff]   ;;  %2167 = vmatmul.mubr.msk.bf16.vlgmr.msra.gmra.mrb[0].mxu1 %vm624_vm2, %v2237_v8  ;;  %2138 = vmatprep.mubr.msk.bf16.mxu0 %vm624_vm2, %v2238_v9  ;;  %v2241_v12 = vld [vmem:[%s2489_s29 + $0x98] sm:$0xff]  }
  0x15   : > { %279 = vst.msk [vmem:[#allocation2 + $0xd8] sm:$0xff] %vm251_vm0, %v2292_v3  ;;  %280 = vst.msk [vmem:[#allocation2 + $0xe0] sm:$0xff] %vm251_vm0, %v2292_v3  ;;  %2170 = vmatprep.mubr.msk.bf16.mxu1 %vm624_vm2, %v2239_v10  ;;  %v2242_v13 = vld [vmem:[%s2489_s29 + $0x20] sm:$0xff]   ;;  %v2244_v15 = vld [vmem:[%s2489_s29 + $0x28] sm:$0xff]  }
  0x16   : > { %281 = vst.msk [vmem:[#allocation2 + $0xe8] sm:$0xff] %vm251_vm0, %v2292_v3  ;;  %282 = vst.msk [vmem:[#allocation2 + $0xf0] sm:$0xff] %vm251_vm0, %v2292_v3  ;;  %v2243_v14 = vld [vmem:[%s2489_s29 + $0xa0] sm:$0xff]   ;;  %v2245_v16 = vld [vmem:[%s2489_s29 + $0xa8] sm:$0xff]  }
  0x17   : > { %283 = vst.msk [vmem:[#allocation2 + $0xf8] sm:$0xff] %vm251_vm0, %v2292_v3  ;;  %284 = vst.msk [vmem:[#allocation2 + $0x100] sm:$0xff] %vm251_vm0, %v2292_v3  ;;  %v2246_v17 = vld [vmem:[%s2489_s29 + $0x30] sm:$0xff]   ;;  %v2248_v19 = vld [vmem:[%s2489_s29 + $0x38] sm:$0xff]  }
  0x18   : > { %285 = vst.msk [vmem:[#allocation2 + $0x108] sm:$0xff] %vm251_vm0, %v2292_v3  ;;  %286 = vst.msk [vmem:[#allocation2 + $0x110] sm:$0xff] %vm251_vm0, %v2292_v3  ;;  %v2247_v18 = vld [vmem:[%s2489_s29 + $0xb0] sm:$0xff]   ;;  %v2249_v20 = vld [vmem:[%s2489_s29 + $0xb8] sm:$0xff]  }
  0x19   : > { %287 = vst.msk [vmem:[#allocation2 + $0x118] sm:$0xff] %vm251_vm0, %v2292_v3  ;;  %288 = vst.msk [vmem:[#allocation2 + $0x120] sm:$0xff] %vm251_vm0, %v2292_v3  ;;  %v2250_v21 = vld [vmem:[%s2489_s29 + $0x40] sm:$0xff]   ;;  %v2252_v23 = vld [vmem:[%s2489_s29 + $0x48] sm:$0xff]  }
  0x1a   : > { %289 = vst.msk [vmem:[#allocation2 + $0x128] sm:$0xff] %vm251_vm0, %v2292_v3  ;;  %290 = vst.msk [vmem:[#allocation2 + $0x130] sm:$0xff] %vm251_vm0, %v2292_v3  ;;  %v2251_v22 = vld [vmem:[%s2489_s29 + $0xc0] sm:$0xff]   ;;  %v2253_v24 = vld [vmem:[%s2489_s29 + $0xc8] sm:$0xff]  }
  0x1b   : > { %291 = vst.msk [vmem:[#allocation2 + $0x138] sm:$0xff] %vm251_vm0, %v2292_v3  ;;  %292 = vst.msk [vmem:[#allocation2 + $0x140] sm:$0xff] %vm251_vm0, %v2292_v3  ;;  %2139 = vmatmul.mubr.msk.bf16.gmra.mrb[4].mxu0 %vm624_vm2, %v2240_v11  ;;  %v2254_v25 = vld [vmem:[%s2489_s29 + $0x50] sm:$0xff]   ;;  %v2256_v27 = vld [vmem:[%s2489_s29 + $0x58] sm:$0xff]  }
  0x1c   : > { %293 = vst.msk [vmem:[#allocation2 + $0x148] sm:$0xff] %vm251_vm0, %v2292_v3  ;;  %294 = vst.msk [vmem:[#allocation2 + $0x150] sm:$0xff] %vm251_vm0, %v2292_v3  ;;  %2171 = vmatmul.mubr.msk.bf16.gmra.mrb[4].mxu1 %vm624_vm2, %v2241_v12  ;;  %2142 = vmatprep.mubr.msk.bf16.mxu0 %vm624_vm2, %v2242_v13  ;;  %v2255_v26 = vld [vmem:[%s2489_s29 + $0xd0] sm:$0xff]   ;;  %v2257_v28 = vld [vmem:[%s2489_s29 + $0xd8] sm:$0xff]  }
  0x1d   : > { %295 = vst.msk [vmem:[#allocation2 + $0x158] sm:$0xff] %vm251_vm0, %v2292_v3  ;;  %296 = vst.msk [vmem:[#allocation2 + $0x160] sm:$0xff] %vm251_vm0, %v2292_v3  ;;  %2174 = vmatprep.mubr.msk.bf16.mxu1 %vm624_vm2, %v2243_v14  ;;  %v2258_v29 = vld [vmem:[%s2489_s29 + $0x60] sm:$0xff]   ;;  %v2260_v31 = vld [vmem:[%s2489_s29 + $0x68] sm:$0xff]  }
  0x1e   : > { %297 = vst.msk [vmem:[#allocation2 + $0x168] sm:$0xff] %vm251_vm0, %v2292_v3  ;;  %298 = vst.msk [vmem:[#allocation2 + $0x170] sm:$0xff] %vm251_vm0, %v2292_v3  ;;  %v2259_v30 = vld [vmem:[%s2489_s29 + $0xe0] sm:$0xff]   ;;  %v2261_v32 = vld [vmem:[%s2489_s29 + $0xe8] sm:$0xff]  }
  0x1f   : > { %299 = vst.msk [vmem:[#allocation2 + $0x178] sm:$0xff] %vm251_vm0, %v2292_v3  ;;  %300 = vst.msk [vmem:[#allocation2 + $0x180] sm:$0xff] %vm251_vm0, %v2292_v3  ;;  %v2262_v33 = vld [vmem:[%s2489_s29 + $0x70] sm:$0xff]   ;;  %v2264_v35 = vld [vmem:[%s2489_s29 + $0x78] sm:$0xff]  }
  0x20   : > { %301 = vst.msk [vmem:[#allocation2 + $0x188] sm:$0xff] %vm251_vm0, %v2292_v3  ;;  %302 = vst.msk [vmem:[#allocation2 + $0x190] sm:$0xff] %vm251_vm0, %v2292_v3  ;;  %v2263_v34 = vld [vmem:[%s2489_s29 + $0xf0] sm:$0xff]   ;;  %v2265_v36 = vld [vmem:[%s2489_s29 + $0xf8] sm:$0xff]  }
  0x21   : > { %303 = vst.msk [vmem:[#allocation2 + $0x198] sm:$0xff] %vm251_vm0, %v2292_v3  ;;  %304 = vst.msk [vmem:[#allocation2 + $0x1a0] sm:$0xff] %vm251_vm0, %v2292_v3  ;;  %v350_v38 = vld [vmem:[#allocation2 + $0x110] sm:$0xff]  ;;  %v348_v40 = vld [vmem:[#allocation2 + $0x100] sm:$0xff] }
  0x22   : > { %305 = vst.msk [vmem:[#allocation2 + $0x1a8] sm:$0xff] %vm251_vm0, %v2292_v3  ;;  %306 = vst.msk [vmem:[#allocation2 + $0x1b0] sm:$0xff] %vm251_vm0, %v2292_v3  ;;  %v351_v44 = vld [vmem:[#allocation2 + $0x118] sm:$0xff]  ;;  %v349_v50 = vld [vmem:[#allocation2 + $0x108] sm:$0xff] }
  0x23   : > { %307 = vst.msk [vmem:[#allocation2 + $0x1b8] sm:$0xff] %vm251_vm0, %v2292_v3  ;;  %308 = vst.msk [vmem:[#allocation2 + $0x1c0] sm:$0xff] %vm251_vm0, %v2292_v3  ;;  %2143 = vmatmul.mubr.msk.bf16.gmra.mrb[8].mxu0 %vm624_vm2, %v2244_v15  ;;  %v322_v61 = vld [vmem:[#allocation2 + $0x30] sm:$0xff]  ;;  %v352_v0 = vld [vmem:[#allocation2 + $0x120] sm:$0xff] }
  0x24   : > { %309 = vst.msk [vmem:[#allocation2 + $0x1c8] sm:$0xff] %vm251_vm0, %v2292_v3  ;;  %310 = vst.msk [vmem:[#allocation2 + $0x1d0] sm:$0xff] %vm251_vm0, %v2292_v3  ;;  %2175 = vmatmul.mubr.msk.bf16.gmra.mrb[8].mxu1 %vm624_vm2, %v2245_v16  ;;  %2146 = vmatprep.mubr.msk.bf16.mxu0 %vm624_vm2, %v2246_v17  ;;  %v354_v62 = vld [vmem:[#allocation2 + $0x130] sm:$0xff]  ;;  %v323_v4 = vld [vmem:[#allocation2 + $0x38] sm:$0xff] }
  0x25   : > { %311 = vst.msk [vmem:[#allocation2 + $0x1d8] sm:$0xff] %vm251_vm0, %v2292_v3  ;;  %312 = vst.msk [vmem:[#allocation2 + $0x1e0] sm:$0xff] %vm251_vm0, %v2292_v3  ;;  %2178 = vmatprep.mubr.msk.bf16.mxu1 %vm624_vm2, %v2247_v18  ;;  %v355_v5 = vld [vmem:[#allocation2 + $0x138] sm:$0xff]  ;;  %v2574_v6 = vld [vmem:[%s3025_s3] ss:$0 sm:$0xff] }
  0x26   : > { %313 = vst.msk [vmem:[#allocation2 + $0x1e8] sm:$0xff] %vm251_vm0, %v2292_v3  ;;  %314 = vst.msk [vmem:[#allocation2 + $0x1f0] sm:$0xff] %vm251_vm0, %v2292_v3  ;;  %v321_v11 = vld [vmem:[#allocation2 + $0x28] sm:$0xff] }
  0x27   : > { %315 = vst.msk [vmem:[#allocation2 + $0x1f8] sm:$0xff] %vm251_vm0, %v2292_v3  ;;  %v353_v12 = vld [vmem:[#allocation2 + $0x128] sm:$0xff] }
  0x2b   : > { %2147 = vmatmul.mubr.msk.bf16.gmra.mrb[12].mxu0 %vm624_vm2, %v2248_v19 }
  0x2c   : > { %2179 = vmatmul.mubr.msk.bf16.gmra.mrb[12].mxu1 %vm624_vm2, %v2249_v20  ;;  %2150 = vmatprep.mubr.msk.bf16.mxu0 %vm624_vm2, %v2250_v21 }
  0x2d   : > { %2182 = vmatprep.mubr.msk.bf16.mxu1 %vm624_vm2, %v2251_v22 }
  0x33   : > { %2151 = vmatmul.mubr.msk.bf16.gmra.mrb[16].mxu0 %vm624_vm2, %v2252_v23 }
  0x34   : > { %2183 = vmatmul.mubr.msk.bf16.gmra.mrb[16].mxu1 %vm624_vm2, %v2253_v24  ;;  %2154 = vmatprep.mubr.msk.bf16.mxu0 %vm624_vm2, %v2254_v25 }
  0x35   : > { %2186 = vmatprep.mubr.msk.bf16.mxu1 %vm624_vm2, %v2255_v26 }
  0x3b   : > { %2155 = vmatmul.mubr.msk.bf16.gmra.mrb[20].mxu0 %vm624_vm2, %v2256_v27 }
  0x3c   : > { %2187 = vmatmul.mubr.msk.bf16.gmra.mrb[20].mxu1 %vm624_vm2, %v2257_v28  ;;  %2158 = vmatprep.mubr.msk.bf16.mxu0 %vm624_vm2, %v2258_v29 }
  0x3d   : > { %2190 = vmatprep.mubr.msk.bf16.mxu1 %vm624_vm2, %v2259_v30 }
  0x43   : > { %2159 = vmatmul.mubr.msk.bf16.gmra.mrb[24].mxu0 %vm624_vm2, %v2260_v31 }
  0x44   : > { %2191 = vmatmul.mubr.msk.bf16.gmra.mrb[24].mxu1 %vm624_vm2, %v2261_v32  ;;  %2162 = vmatprep.mubr.msk.bf16.mxu0 %vm624_vm2, %v2262_v33 }
  0x45   : > { %2194 = vmatprep.mubr.msk.bf16.mxu1 %vm624_vm2, %v2263_v34 }
  0x4b   : > { %2163 = vmatmul.mubr.msk.bf16.gmra.mrb[28].mxu0 %vm624_vm2, %v2264_v35 }
  0x4c   : > { %2195 = vmatmul.mubr.msk.bf16.gmra.mrb[28].mxu1 %vm624_vm2, %v2265_v36 }
  0xe6   : > { %v2136_v41 = vpop.f32.mrb[0].mxu0 }
  0xe7   : > { %v2168_v42 = vpop.f32.mrb[0].mxu1  ;;  %v1016_v45 = vadd.f32 %v2136_v41, %v318_v37  ;;  %v759_v47 = vpop.f32.mrb[1].mxu0 }
  0xe8   : > { %v1048_v46 = vadd.f32 %v2168_v42, %v350_v38  ;;  %v887_v48 = vpop.f32.mrb[1].mxu1  ;;  %v1014_v51 = vadd.f32 %v759_v47, %v316_v39  ;;  %v2137_v53 = vpop.f32.mrb[2].mxu0 }
  0xe9   : > { %v1046_v52 = vadd.f32 %v887_v48, %v348_v40  ;;  %v2169_v54 = vpop.f32.mrb[2].mxu1  ;;  %1081 = vst.msk [vmem:[#allocation2 + $0x10] sm:$0xff] %vm251_vm0, %v1016_v45  ;;  %v1017_v55 = vadd.f32 %v2137_v53, %v319_v43  ;;  %v762_v57 = vpop.f32.mrb[3].mxu0 }
  0xea   : > { %1113 = vst.msk [vmem:[#allocation2 + $0x110] sm:$0xff] %vm251_vm0, %v1048_v46  ;;  %v1049_v56 = vadd.f32 %v2169_v54, %v351_v44  ;;  %v890_v58 = vpop.f32.mrb[3].mxu1  ;;  %1079 = vst.msk [vmem:[#allocation2] sm:$0xff] %vm251_vm0, %v1014_v51  ;;  %v1015_v59 = vadd.f32 %v762_v57, %v317_v49 }
  0xeb   : > { %1111 = vst.msk [vmem:[#allocation2 + $0x100] sm:$0xff] %vm251_vm0, %v1046_v52  ;;  %v1047_v60 = vadd.f32 %v890_v58, %v349_v50  ;;  %1082 = vst.msk [vmem:[#allocation2 + $0x18] sm:$0xff] %vm251_vm0, %v1017_v55 }
  0xec   : > { %1114 = vst.msk [vmem:[#allocation2 + $0x118] sm:$0xff] %vm251_vm0, %v1049_v56  ;;  %1080 = vst.msk [vmem:[#allocation2 + $0x8] sm:$0xff] %vm251_vm0, %v1015_v59 }
  0xed   : > { %1112 = vst.msk [vmem:[#allocation2 + $0x108] sm:$0xff] %vm251_vm0, %v1047_v60 }
  0xee   : > { %v2140_v2 = vpop.f32.mrb[4].mxu0 }
  0xef   : > { %v2172_v3 = vpop.f32.mrb[4].mxu1  ;;  %v1020_v7 = vadd.f32 %v2140_v2, %v322_v61  ;;  %v775_v9 = vpop.f32.mrb[5].mxu0 }
  0xf0   : > { %v1052_v8 = vadd.f32 %v2172_v3, %v354_v62  ;;  %v903_v10 = vpop.f32.mrb[5].mxu1  ;;  %v1148_v13 = vld [vmem:[#allocation2 + $0x10] sm:$0xff]  ;;  %v1018_v15 = vadd.f32 %v775_v9, %v320_v63  ;;  %v2141_v17 = vpop.f32.mrb[6].mxu0 }
  0xf1   : > { %v1180_v14 = vld [vmem:[#allocation2 + $0x110] sm:$0xff]  ;;  %v1050_v16 = vadd.f32 %v903_v10, %v352_v0  ;;  %v2173_v18 = vpop.f32.mrb[6].mxu1  ;;  %v1219_v19 = vmul.f32 %v2569_v1, %v1148_v13  ;;  %v1146_v21 = vld [vmem:[#allocation2] sm:$0xff]  ;;  %1085 = vst.msk [vmem:[#allocation2 + $0x30] sm:$0xff] %vm251_vm0, %v1020_v7  ;;  %v1021_v23 = vadd.f32 %v2141_v17, %v323_v4  ;;  %v778_v25 = vpop.f32.mrb[7].mxu0 }
  0xf2   : > { %v1251_v20 = vmul.f32 %v2569_v1, %v1180_v14  ;;  %v1178_v22 = vld [vmem:[#allocation2 + $0x100] sm:$0xff]  ;;  %1117 = vst.msk [vmem:[#allocation2 + $0x130] sm:$0xff] %vm251_vm0, %v1052_v8  ;;  %v1053_v24 = vadd.f32 %v2173_v18, %v355_v5  ;;  %v906_v26 = vpop.f32.mrb[7].mxu1  ;;  %v1217_v27 = vmul.f32 %v2569_v1, %v1146_v21  ;;  %v1149_v29 = vld [vmem:[#allocation2 + $0x18] sm:$0xff]  ;;  %1083 = vst.msk [vmem:[#allocation2 + $0x20] sm:$0xff] %vm251_vm0, %v1018_v15 }
  0xf3   : > { %v1249_v28 = vmul.f32 %v2569_v1, %v1178_v22  ;;  %v1181_v30 = vld [vmem:[#allocation2 + $0x118] sm:$0xff]  ;;  %1115 = vst.msk [vmem:[#allocation2 + $0x120] sm:$0xff] %vm251_vm0, %v1050_v16  ;;  %v1019_v31 = vadd.f32 %v778_v25, %v321_v11  ;;  %v1051_v32 = vadd.f32 %v906_v26, %v353_v12  ;;  %v1290_v33 = vadd.f32 %v2574_v6, %v1219_v19  ;;  %v1147_v37 = vld [vmem:[#allocation2 + $0x8] sm:$0xff] }
  0xf4   : > { %v1322_v34 = vadd.f32 %v2574_v6, %v1251_v20  ;;  %v1220_v35 = vmul.f32 %v2569_v1, %v1149_v29  ;;  %v1252_v36 = vmul.f32 %v2569_v1, %v1181_v30  ;;  %v1179_v38 = vld [vmem:[#allocation2 + $0x108] sm:$0xff]  ;;  %1086 = vst.msk [vmem:[#allocation2 + $0x38] sm:$0xff] %vm251_vm0, %v1021_v23  ;;  %1118 = vst.msk [vmem:[#allocation2 + $0x138] sm:$0xff] %vm251_vm0, %v1053_v24 }
  0xf5   : > { %v1288_v39 = vadd.f32 %v2574_v6, %v1217_v27  ;;  %v1320_v40 = vadd.f32 %v2574_v6, %v1249_v28  ;;  %v1218_v41 = vmul.f32 %v2569_v1, %v1147_v37  ;;  %v1250_v42 = vmul.f32 %v2569_v1, %v1179_v38  ;;  %1084 = vst.msk [vmem:[#allocation2 + $0x28] sm:$0xff] %vm251_vm0, %v1019_v31 }
  0xf6   : > { %1116 = vst.msk [vmem:[#allocation2 + $0x128] sm:$0xff] %vm251_vm0, %v1051_v32  ;;  %v1354_v43 = vmax.f32 %v1290_v33, 0.0  ;;  %v1386_v44 = vmax.f32 %v1322_v34, 0.0  ;;  %v1291_v45 = vadd.f32 %v2574_v6, %v1220_v35  ;;  %v1323_v46 = vadd.f32 %v2574_v6, %v1252_v36  ;;  %v2600_v51 = vpop.f32.mrb[8].mxu0 }
  0xf7   : > { %v1352_v47 = vmax.f32 %v1288_v39, 0.0  ;;  %v1384_v48 = vmax.f32 %v1320_v40, 0.0  ;;  %v1289_v49 = vadd.f32 %v2574_v6, %v1218_v41  ;;  %v1321_v50 = vadd.f32 %v2574_v6, %v1250_v42  ;;  %v2602_v52 = vpop.f32.mrb[8].mxu1  ;;  %v2604_v57 = vpop.f32.mrb[9].mxu0 }
  0xf8   : > { %v1418_v53 = vmin.f32 %v1354_v43, 6.0  ;;  %v1450_v54 = vmin.f32 %v1386_v44, 6.0  ;;  %v1355_v55 = vmax.f32 %v1291_v45, 0.0  ;;  %v1387_v56 = vmax.f32 %v1323_v46, 0.0  ;;  %v2606_v58 = vpop.f32.mrb[9].mxu1  ;;  %v1152_v63 = vld [vmem:[#allocation2 + $0x30] sm:$0xff] }
  0xf9   : > { %v1416_v59 = vmin.f32 %v1352_v47, 6.0  ;;  %v1448_v60 = vmin.f32 %v1384_v48, 6.0  ;;  %v1353_v61 = vmax.f32 %v1289_v49, 0.0  ;;  %v1385_v62 = vmax.f32 %v1321_v50, 0.0  ;;  %v1184_v0 = vld [vmem:[#allocation2 + $0x130] sm:$0xff]  ;;  %v1150_v7 = vld [vmem:[#allocation2 + $0x20] sm:$0xff] }
  0xfa   : > { %v2031_v2 = vpack.c.bf16 %v1418_v53, %v1418_v53  ;;  %v2063_v3 = vpack.c.bf16 %v1450_v54, %v1450_v54  ;;  %v1419_v4 = vmin.f32 %v1355_v55, 6.0  ;;  %v1451_v5 = vmin.f32 %v1387_v56, 6.0  ;;  %v1182_v8 = vld [vmem:[#allocation2 + $0x120] sm:$0xff]  ;;  %v2615_v9 = vpop.f32.mrb[10].mxu0  ;;  %v2617_v10 = vpop.f32.mrb[10].mxu1  ;;  %v326_v49 = vld [vmem:[#allocation2 + $0x50] sm:$0xff] }
  0xfb   : > { %v2029_v11 = vpack.c.bf16 %v1416_v59, %v1416_v59  ;;  %v2061_v12 = vpack.c.bf16 %v1448_v60, %v1448_v60  ;;  %v1417_v13 = vmin.f32 %v1353_v61, 6.0  ;;  %v1449_v14 = vmin.f32 %v1385_v62, 6.0  ;;  %v1153_v15 = vld [vmem:[#allocation2 + $0x38] sm:$0xff]  ;;  %v2619_v17 = vpop.f32.mrb[11].mxu0  ;;  %v2621_v18 = vpop.f32.mrb[11].mxu1  ;;  %v358_v50 = vld [vmem:[#allocation2 + $0x150] sm:$0xff] }
  0xfc   : > { %v1185_v16 = vld [vmem:[#allocation2 + $0x138] sm:$0xff]  ;;  %1739 = vst.msk [vmem:[%s2613_s10 + $0x8] sm:$0xf] %vm1736_vm3, %v2031_v2  ;;  %1771 = vst.msk [vmem:[%s2613_s10 + $0x88] sm:$0xf] %vm1736_vm3, %v2063_v3  ;;  %v2032_v19 = vpack.c.bf16 %v1419_v4, %v1419_v4  ;;  %v2064_v20 = vpack.c.bf16 %v1451_v5, %v1451_v5  ;;  %v1223_v21 = vmul.f32 %v2569_v1, %v1152_v63  ;;  %v1151_v23 = vld [vmem:[#allocation2 + $0x28] sm:$0xff] }
  0xfd   : > { %v1255_v22 = vmul.f32 %v2569_v1, %v1184_v0  ;;  %v1183_v24 = vld [vmem:[#allocation2 + $0x128] sm:$0xff]  ;;  %1737 = vst.msk [vmem:[%s2613_s10] sm:$0xf] %vm1736_vm3, %v2029_v11  ;;  %1769 = vst.msk [vmem:[%s2613_s10 + $0x80] sm:$0xf] %vm1736_vm3, %v2061_v12  ;;  %v2030_v25 = vpack.c.bf16 %v1417_v13, %v1417_v13  ;;  %v2062_v26 = vpack.c.bf16 %v1449_v14, %v1449_v14  ;;  %v324_v61 = vld [vmem:[#allocation2 + $0x40] sm:$0xff] }
  0xfe   : > { %v1221_v27 = vmul.f32 %v2569_v1, %v1150_v7  ;;  %v1253_v28 = vmul.f32 %v2569_v1, %v1182_v8  ;;  %1740 = vst.msk [vmem:[%s2613_s10 + $0xc] sm:$0xf] %vm1736_vm3, %v2032_v19  ;;  %1772 = vst.msk [vmem:[%s2613_s10 + $0x8c] sm:$0xf] %vm1736_vm3, %v2064_v20  ;;  %v1294_v29 = vadd.f32 %v2574_v6, %v1223_v21  ;;  %v2651_v37 = vpop.f32.mrb[12].mxu0  ;;  %v356_v62 = vld [vmem:[#allocation2 + $0x140] sm:$0xff] }
  0xff   : > { %v1326_v30 = vadd.f32 %v2574_v6, %v1255_v22  ;;  %v1224_v31 = vmul.f32 %v2569_v1, %v1153_v15  ;;  %v1256_v32 = vmul.f32 %v2569_v1, %v1185_v16  ;;  %1738 = vst.msk [vmem:[%s2613_s10 + $0x4] sm:$0xf] %vm1736_vm3, %v2030_v25  ;;  %1770 = vst.msk [vmem:[%s2613_s10 + $0x84] sm:$0xf] %vm1736_vm3, %v2062_v26  ;;  %v2653_v38 = vpop.f32.mrb[12].mxu1  ;;  %v2657_v43 = vpop.f32.mrb[13].mxu0 }
 0x100   : > { %v1292_v33 = vadd.f32 %v2574_v6, %v1221_v27  ;;  %v1324_v34 = vadd.f32 %v2574_v6, %v1253_v28  ;;  %v1222_v35 = vmul.f32 %v2569_v1, %v1151_v23  ;;  %v1254_v36 = vmul.f32 %v2569_v1, %v1183_v24  ;;  %v2659_v44 = vpop.f32.mrb[13].mxu1  ;;  %v2663_v53 = vpop.f32.mrb[14].mxu0  ;;  %v327_v7 = vld [vmem:[#allocation2 + $0x58] sm:$0xff]  ;;  %v325_v15 = vld [vmem:[#allocation2 + $0x48] sm:$0xff]  ;;  %v330_v19 = vld [vmem:[#allocation2 + $0x70] sm:$0xff] }
 0x101   : > { %v1358_v39 = vmax.f32 %v1294_v29, 0.0  ;;  %v1390_v40 = vmax.f32 %v1326_v30, 0.0  ;;  %v1295_v41 = vadd.f32 %v2574_v6, %v1224_v31  ;;  %v1327_v42 = vadd.f32 %v2574_v6, %v1256_v32  ;;  %v2665_v54 = vpop.f32.mrb[14].mxu1  ;;  %v2667_v63 = vpop.f32.mrb[15].mxu0  ;;  %v359_v8 = vld [vmem:[#allocation2 + $0x158] sm:$0xff]  ;;  %v357_v16 = vld [vmem:[#allocation2 + $0x148] sm:$0xff] }
 0x102   : > { %v1356_v45 = vmax.f32 %v1292_v33, 0.0  ;;  %v1388_v46 = vmax.f32 %v1324_v34, 0.0  ;;  %v1293_v47 = vadd.f32 %v2574_v6, %v1222_v35  ;;  %v1325_v48 = vadd.f32 %v2574_v6, %v1254_v36  ;;  %v2669_v0 = vpop.f32.mrb[15].mxu1  ;;  %v362_v24 = vld [vmem:[#allocation2 + $0x170] sm:$0xff]  ;;  %v328_v25 = vld [vmem:[#allocation2 + $0x60] sm:$0xff]  ;;  %v331_v31 = vld [vmem:[#allocation2 + $0x78] sm:$0xff] }
 0x103   : > { %v1422_v55 = vmin.f32 %v1358_v39, 6.0  ;;  %v1454_v56 = vmin.f32 %v1390_v40, 6.0  ;;  %v1359_v59 = vmax.f32 %v1295_v41, 0.0  ;;  %v1391_v60 = vmax.f32 %v1327_v42, 0.0  ;;  %v360_v26 = vld [vmem:[#allocation2 + $0x160] sm:$0xff]  ;;  %v363_v32 = vld [vmem:[#allocation2 + $0x178] sm:$0xff] }
 0x104   : > { %v1420_v2 = vmin.f32 %v1356_v45, 6.0  ;;  %v1452_v3 = vmin.f32 %v1388_v46, 6.0  ;;  %v1357_v4 = vmax.f32 %v1293_v47, 0.0  ;;  %v1389_v5 = vmax.f32 %v1325_v48, 0.0  ;;  %v329_v33 = vld [vmem:[#allocation2 + $0x68] sm:$0xff]  ;;  %v334_v41 = vld [vmem:[#allocation2 + $0x90] sm:$0xff] }
 0x105   : > { %v2035_v11 = vpack.c.bf16 %v1422_v55, %v1422_v55  ;;  %v2067_v12 = vpack.c.bf16 %v1454_v56, %v1454_v56  ;;  %v1423_v13 = vmin.f32 %v1359_v59, 6.0  ;;  %v1455_v14 = vmin.f32 %v1391_v60, 6.0  ;;  %v361_v40 = vld [vmem:[#allocation2 + $0x168] sm:$0xff]  ;;  %v366_v42 = vld [vmem:[#allocation2 + $0x190] sm:$0xff]  ;;  %v332_v47 = vld [vmem:[#allocation2 + $0x80] sm:$0xff] }
 0x106   : > { %v2033_v20 = vpack.c.bf16 %v1420_v2, %v1420_v2  ;;  %v2065_v21 = vpack.c.bf16 %v1452_v3, %v1452_v3  ;;  %v1421_v22 = vmin.f32 %v1357_v4, 6.0  ;;  %v1453_v23 = vmin.f32 %v1389_v5, 6.0  ;;  %v335_v55 = vld [vmem:[#allocation2 + $0x98] sm:$0xff] }
 0x107   : > { %1743 = vst.msk [vmem:[%s2613_s10 + $0x18] sm:$0xf] %vm1736_vm3, %v2035_v11  ;;  %1775 = vst.msk [vmem:[%s2613_s10 + $0x98] sm:$0xf] %vm1736_vm3, %v2067_v12  ;;  %v2036_v27 = vpack.c.bf16 %v1423_v13, %v1423_v13  ;;  %v2068_v28 = vpack.c.bf16 %v1455_v14, %v1455_v14  ;;  %v1024_v29 = vadd.f32 %v2600_v51, %v326_v49  ;;  %v2152_v51 = vpop.f32.mrb[16].mxu0  ;;  %v364_v49 = vld [vmem:[#allocation2 + $0x180] sm:$0xff] }
 0x108   : > { %v1056_v30 = vadd.f32 %v2602_v52, %v358_v50  ;;  %1741 = vst.msk [vmem:[%s2613_s10 + $0x10] sm:$0xf] %vm1736_vm3, %v2033_v20  ;;  %1773 = vst.msk [vmem:[%s2613_s10 + $0x90] sm:$0xf] %vm1736_vm3, %v2065_v21  ;;  %v2034_v34 = vpack.c.bf16 %v1421_v22, %v1421_v22  ;;  %v2066_v35 = vpack.c.bf16 %v1453_v23, %v1453_v23  ;;  %v2184_v52 = vpop.f32.mrb[16].mxu1  ;;  %v823_v48 = vpop.f32.mrb[17].mxu0 }
 0x109   : > { %v1022_v36 = vadd.f32 %v2604_v57, %v324_v61  ;;  %v1054_v39 = vadd.f32 %v2606_v58, %v356_v62  ;;  %1744 = vst.msk [vmem:[%s2613_s10 + $0x1c] sm:$0xf] %vm1736_vm3, %v2036_v27  ;;  %1776 = vst.msk [vmem:[%s2613_s10 + $0x9c] sm:$0xf] %vm1736_vm3, %v2068_v28  ;;  %v1025_v45 = vadd.f32 %v2615_v9, %v327_v7  ;;  %v951_v50 = vpop.f32.mrb[17].mxu1  ;;  %v2153_v56 = vpop.f32.mrb[18].mxu0 }
 0x10a   : > { %1089 = vst.msk [vmem:[#allocation2 + $0x50] sm:$0xff] %vm251_vm0, %v1024_v29  ;;  %1121 = vst.msk [vmem:[#allocation2 + $0x150] sm:$0xff] %vm251_vm0, %v1056_v30  ;;  %v1057_v57 = vadd.f32 %v2617_v10, %v359_v8  ;;  %v1023_v58 = vadd.f32 %v2619_v17, %v325_v15  ;;  %v1055_v46 = vadd.f32 %v2621_v18, %v357_v16  ;;  %v367_v59 = vld [vmem:[#allocation2 + $0x198] sm:$0xff]  ;;  %v2185_v60 = vpop.f32.mrb[18].mxu1  ;;  %v333_v61 = vld [vmem:[#allocation2 + $0x88] sm:$0xff]  ;;  %v826_v2 = vpop.f32.mrb[19].mxu0 }
 0x10b   : > { %1742 = vst.msk [vmem:[%s2613_s10 + $0x14] sm:$0xf] %vm1736_vm3, %v2034_v34  ;;  %1774 = vst.msk [vmem:[%s2613_s10 + $0x94] sm:$0xf] %vm1736_vm3, %v2066_v35  ;;  %v1028_v9 = vadd.f32 %v2651_v37, %v330_v19  ;;  %v1060_v10 = vadd.f32 %v2653_v38, %v362_v24  ;;  %v1026_v17 = vadd.f32 %v2657_v43, %v328_v25  ;;  %v365_v62 = vld [vmem:[#allocation2 + $0x188] sm:$0xff]  ;;  %v954_v3 = vpop.f32.mrb[19].mxu1 }
 0x10c   : > { %1087 = vst.msk [vmem:[#allocation2 + $0x40] sm:$0xff] %vm251_vm0, %v1022_v36  ;;  %1119 = vst.msk [vmem:[#allocation2 + $0x140] sm:$0xff] %vm251_vm0, %v1054_v39  ;;  %v1058_v18 = vadd.f32 %v2659_v44, %v360_v26  ;;  %v1029_v37 = vadd.f32 %v2663_v53, %v331_v31  ;;  %v1061_v38 = vadd.f32 %v2665_v54, %v363_v32  ;;  %v338_v11 = vld [vmem:[#allocation2 + $0xb0] sm:$0xff]  ;;  %v336_v13 = vld [vmem:[#allocation2 + $0xa0] sm:$0xff] }
 0x10d   : > { %1090 = vst.msk [vmem:[#allocation2 + $0x58] sm:$0xff] %vm251_vm0, %v1025_v45  ;;  %1122 = vst.msk [vmem:[#allocation2 + $0x158] sm:$0xff] %vm251_vm0, %v1057_v57  ;;  %v1027_v43 = vadd.f32 %v2667_v63, %v329_v33  ;;  %v1059_v44 = vadd.f32 %v2669_v0, %v361_v40  ;;  %v1032_v4 = vadd.f32 %v2152_v51, %v334_v41  ;;  %v370_v12 = vld [vmem:[#allocation2 + $0x1b0] sm:$0xff]  ;;  %v368_v14 = vld [vmem:[#allocation2 + $0x1a0] sm:$0xff] }
 0x10e   : > { %1088 = vst.msk [vmem:[#allocation2 + $0x48] sm:$0xff] %vm251_vm0, %v1023_v58  ;;  %1120 = vst.msk [vmem:[#allocation2 + $0x148] sm:$0xff] %vm251_vm0, %v1055_v46  ;;  %v1064_v5 = vadd.f32 %v2184_v52, %v366_v42  ;;  %v1030_v7 = vadd.f32 %v823_v48, %v332_v47  ;;  %v1062_v53 = vadd.f32 %v951_v50, %v364_v49  ;;  %v2156_v19 = vpop.f32.mrb[20].mxu0 }
 0x10f   : > { %1093 = vst.msk [vmem:[#allocation2 + $0x70] sm:$0xff] %vm251_vm0, %v1028_v9  ;;  %1125 = vst.msk [vmem:[#allocation2 + $0x170] sm:$0xff] %vm251_vm0, %v1060_v10  ;;  %v1033_v54 = vadd.f32 %v2153_v56, %v335_v55  ;;  %v1065_v63 = vadd.f32 %v2185_v60, %v367_v59  ;;  %v1031_v0 = vadd.f32 %v826_v2, %v333_v61  ;;  %v2188_v20 = vpop.f32.mrb[20].mxu1  ;;  %v839_v27 = vpop.f32.mrb[21].mxu0 }
 0x110   : > { %1091 = vst.msk [vmem:[#allocation2 + $0x60] sm:$0xff] %vm251_vm0, %v1026_v17  ;;  %1123 = vst.msk [vmem:[#allocation2 + $0x160] sm:$0xff] %vm251_vm0, %v1058_v18  ;;  %v1063_v8 = vadd.f32 %v954_v3, %v365_v62  ;;  %v1036_v25 = vadd.f32 %v2156_v19, %v338_v11  ;;  %v1068_v26 = vadd.f32 %v2188_v20, %v370_v12  ;;  %v967_v28 = vpop.f32.mrb[21].mxu1  ;;  %v2731_v36 = vpop.f32.mrb[22].mxu0 }
 0x111   : > { %1094 = vst.msk [vmem:[#allocation2 + $0x78] sm:$0xff] %vm251_vm0, %v1029_v37  ;;  %1126 = vst.msk [vmem:[#allocation2 + $0x178] sm:$0xff] %vm251_vm0, %v1061_v38  ;;  %v1156_v15 = vld [vmem:[#allocation2 + $0x50] sm:$0xff]  ;;  %v1034_v34 = vadd.f32 %v839_v27, %v336_v13  ;;  %v1066_v35 = vadd.f32 %v967_v28, %v368_v14  ;;  %v2733_v39 = vpop.f32.mrb[22].mxu1  ;;  %v2741_v45 = vpop.f32.mrb[23].mxu0 }
 0x112   : > { %1092 = vst.msk [vmem:[#allocation2 + $0x68] sm:$0xff] %vm251_vm0, %v1027_v43  ;;  %1124 = vst.msk [vmem:[#allocation2 + $0x168] sm:$0xff] %vm251_vm0, %v1059_v44  ;;  %v1188_v16 = vld [vmem:[#allocation2 + $0x150] sm:$0xff]  ;;  %v1227_v21 = vmul.f32 %v2569_v1, %v1156_v15  ;;  %v2743_v57 = vpop.f32.mrb[23].mxu1 }
 0x113   : > { %1097 = vst.msk [vmem:[#allocation2 + $0x90] sm:$0xff] %vm251_vm0, %v1032_v4  ;;  %1129 = vst.msk [vmem:[#allocation2 + $0x190] sm:$0xff] %vm251_vm0, %v1064_v5  ;;  %v1259_v22 = vmul.f32 %v2569_v1, %v1188_v16  ;;  %v1154_v23 = vld [vmem:[#allocation2 + $0x40] sm:$0xff] }
 0x114   : > { %1095 = vst.msk [vmem:[#allocation2 + $0x80] sm:$0xff] %vm251_vm0, %v1030_v7  ;;  %1127 = vst.msk [vmem:[#allocation2 + $0x180] sm:$0xff] %vm251_vm0, %v1062_v53  ;;  %v1186_v24 = vld [vmem:[#allocation2 + $0x140] sm:$0xff]  ;;  %v1225_v29 = vmul.f32 %v2569_v1, %v1154_v23  ;;  %v1157_v31 = vld [vmem:[#allocation2 + $0x58] sm:$0xff]  ;;  %v1298_v40 = vadd.f32 %v2574_v6, %v1227_v21 }
 0x115   : > { %1098 = vst.msk [vmem:[#allocation2 + $0x98] sm:$0xff] %vm251_vm0, %v1033_v54  ;;  %1130 = vst.msk [vmem:[#allocation2 + $0x198] sm:$0xff] %vm251_vm0, %v1065_v63  ;;  %v1257_v30 = vmul.f32 %v2569_v1, %v1186_v24  ;;  %v1189_v32 = vld [vmem:[#allocation2 + $0x158] sm:$0xff]  ;;  %v1155_v33 = vld [vmem:[#allocation2 + $0x48] sm:$0xff]  ;;  %v1330_v41 = vadd.f32 %v2574_v6, %v1259_v22  ;;  %v1228_v51 = vmul.f32 %v2569_v1, %v1157_v31 }
 0x116   : > { %1096 = vst.msk [vmem:[#allocation2 + $0x88] sm:$0xff] %vm251_vm0, %v1031_v0  ;;  %1128 = vst.msk [vmem:[#allocation2 + $0x188] sm:$0xff] %vm251_vm0, %v1063_v8  ;;  %v1260_v42 = vmul.f32 %v2569_v1, %v1189_v32  ;;  %v1187_v52 = vld [vmem:[#allocation2 + $0x148] sm:$0xff]  ;;  %v1296_v58 = vadd.f32 %v2574_v6, %v1225_v29  ;;  %v1226_v47 = vmul.f32 %v2569_v1, %v1155_v33  ;;  %v1362_v49 = vmax.f32 %v1298_v40, 0.0  ;;  %v1160_v2 = vld [vmem:[#allocation2 + $0x70] sm:$0xff]  ;;  %v2755_v0 = vpop.f32.mrb[24].mxu0 }
 0x117   : > { %1101 = vst.msk [vmem:[#allocation2 + $0xb0] sm:$0xff] %vm251_vm0, %v1036_v25  ;;  %1133 = vst.msk [vmem:[#allocation2 + $0x1b0] sm:$0xff] %vm251_vm0, %v1068_v26  ;;  %v1328_v46 = vadd.f32 %v2574_v6, %v1257_v30  ;;  %v1258_v48 = vmul.f32 %v2569_v1, %v1187_v52  ;;  %v1394_v50 = vmax.f32 %v1330_v41, 0.0  ;;  %v1299_v55 = vadd.f32 %v2574_v6, %v1228_v51  ;;  %v1192_v3 = vld [vmem:[#allocation2 + $0x170] sm:$0xff]  ;;  %v1158_v54 = vld [vmem:[#allocation2 + $0x60] sm:$0xff]  ;;  %v2757_v8 = vpop.f32.mrb[24].mxu1 }
 0x118   : > { %1099 = vst.msk [vmem:[#allocation2 + $0xa0] sm:$0xff] %vm251_vm0, %v1034_v34  ;;  %1131 = vst.msk [vmem:[#allocation2 + $0x1a0] sm:$0xff] %vm251_vm0, %v1066_v35  ;;  %v1331_v9 = vadd.f32 %v2574_v6, %v1260_v42  ;;  %v1360_v10 = vmax.f32 %v1296_v58, 0.0  ;;  %v1297_v18 = vadd.f32 %v2574_v6, %v1226_v47  ;;  %v1426_v59 = vmin.f32 %v1362_v49, 6.0  ;;  %v1190_v63 = vld [vmem:[#allocation2 + $0x160] sm:$0xff]  ;;  %v1161_v15 = vld [vmem:[#allocation2 + $0x78] sm:$0xff] }
 0x119   : > { %v1392_v17 = vmax.f32 %v1328_v46, 0.0  ;;  %v1329_v56 = vadd.f32 %v2574_v6, %v1258_v48  ;;  %v1458_v60 = vmin.f32 %v1394_v50, 6.0  ;;  %v1363_v61 = vmax.f32 %v1299_v55, 0.0  ;;  %v1193_v16 = vld [vmem:[#allocation2 + $0x178] sm:$0xff]  ;;  %v2759_v19 = vpop.f32.mrb[25].mxu0  ;;  %v2761_v20 = vpop.f32.mrb[25].mxu1 }
 0x11a   : > { %v1395_v62 = vmax.f32 %v1331_v9, 0.0  ;;  %v1424_v37 = vmin.f32 %v1360_v10, 6.0  ;;  %v1361_v43 = vmax.f32 %v1297_v18, 0.0  ;;  %v2039_v4 = vpack.c.bf16 %v1426_v59, %v1426_v59  ;;  %v1159_v25 = vld [vmem:[#allocation2 + $0x68] sm:$0xff]  ;;  %v2769_v27 = vpop.f32.mrb[26].mxu0  ;;  %v2771_v28 = vpop.f32.mrb[26].mxu1 }
 0x11b   : > { %v1456_v38 = vmin.f32 %v1392_v17, 6.0  ;;  %v1393_v44 = vmax.f32 %v1329_v56, 0.0  ;;  %v2071_v5 = vpack.c.bf16 %v1458_v60, %v1458_v60  ;;  %v1427_v7 = vmin.f32 %v1363_v61, 6.0  ;;  %v1191_v26 = vld [vmem:[#allocation2 + $0x168] sm:$0xff]  ;;  %v2779_v33 = vpop.f32.mrb[27].mxu0  ;;  %v2781_v34 = vpop.f32.mrb[27].mxu1 }
 0x11c   : > { %v1459_v53 = vmin.f32 %v1395_v62, 6.0  ;;  %v2037_v11 = vpack.c.bf16 %v1424_v37, %v1424_v37  ;;  %v1425_v13 = vmin.f32 %v1361_v43, 6.0  ;;  %1747 = vst.msk [vmem:[%s2613_s10 + $0x28] sm:$0xf] %vm1736_vm3, %v2039_v4  ;;  %v1231_v23 = vmul.f32 %v2569_v1, %v1160_v2  ;;  %v1164_v18 = vld [vmem:[#allocation2 + $0x90] sm:$0xff] }
 0x11d   : > { %v2069_v12 = vpack.c.bf16 %v1456_v38, %v1456_v38  ;;  %v1457_v14 = vmin.f32 %v1393_v44, 6.0  ;;  %1779 = vst.msk [vmem:[%s2613_s10 + $0xa8] sm:$0xf] %vm1736_vm3, %v2071_v5  ;;  %v2040_v21 = vpack.c.bf16 %v1427_v7, %v1427_v7  ;;  %v1263_v24 = vmul.f32 %v2569_v1, %v1192_v3  ;;  %v1196_v56 = vld [vmem:[#allocation2 + $0x190] sm:$0xff] }
 0x11e   : > { %v2072_v22 = vpack.c.bf16 %v1459_v53, %v1459_v53  ;;  %1745 = vst.msk [vmem:[%s2613_s10 + $0x20] sm:$0xf] %vm1736_vm3, %v2037_v11  ;;  %v2038_v29 = vpack.c.bf16 %v1425_v13, %v1425_v13  ;;  %v1229_v31 = vmul.f32 %v2569_v1, %v1158_v54  ;;  %v1261_v32 = vmul.f32 %v2569_v1, %v1190_v63  ;;  %v2803_v59 = vpop.f32.mrb[28].mxu0  ;;  %v1162_v13 = vld [vmem:[#allocation2 + $0x80] sm:$0xff] }
 0x11f   : > { %1777 = vst.msk [vmem:[%s2613_s10 + $0xa0] sm:$0xf] %vm1736_vm3, %v2069_v12  ;;  %v2070_v30 = vpack.c.bf16 %v1457_v14, %v1457_v14  ;;  %1748 = vst.msk [vmem:[%s2613_s10 + $0x2c] sm:$0xf] %vm1736_vm3, %v2040_v21  ;;  %v1302_v35 = vadd.f32 %v2574_v6, %v1231_v23  ;;  %v1334_v40 = vadd.f32 %v2574_v6, %v1263_v24  ;;  %v2805_v60 = vpop.f32.mrb[28].mxu1  ;;  %v2807_v43 = vpop.f32.mrb[29].mxu0 }
 0x120   : > { %1780 = vst.msk [vmem:[%s2613_s10 + $0xac] sm:$0xf] %vm1736_vm3, %v2072_v22  ;;  %v1232_v41 = vmul.f32 %v2569_v1, %v1161_v15  ;;  %v1264_v51 = vmul.f32 %v2569_v1, %v1193_v16  ;;  %1746 = vst.msk [vmem:[%s2613_s10 + $0x24] sm:$0xf] %vm1736_vm3, %v2038_v29  ;;  %v1300_v42 = vadd.f32 %v2574_v6, %v1229_v31  ;;  %v2809_v44 = vpop.f32.mrb[29].mxu1  ;;  %v2811_v7 = vpop.f32.mrb[30].mxu0 }
 0x121   : > { %1778 = vst.msk [vmem:[%s2613_s10 + $0xa4] sm:$0xf] %vm1736_vm3, %v2070_v30  ;;  %v1332_v52 = vadd.f32 %v2574_v6, %v1261_v32  ;;  %v1230_v58 = vmul.f32 %v2569_v1, %v1159_v25  ;;  %v1262_v46 = vmul.f32 %v2569_v1, %v1191_v26  ;;  %v1366_v47 = vmax.f32 %v1302_v35, 0.0  ;;  %v2813_v53 = vpop.f32.mrb[30].mxu1  ;;  %v1194_v14 = vld [vmem:[#allocation2 + $0x180] sm:$0xff]  ;;  %v2815_v15 = vpop.f32.mrb[31].mxu0 }
 0x122   : > { %v1398_v48 = vmax.f32 %v1334_v40, 0.0  ;;  %v1303_v49 = vadd.f32 %v2574_v6, %v1232_v41  ;;  %v1335_v50 = vadd.f32 %v2574_v6, %v1264_v51  ;;  %v1364_v55 = vmax.f32 %v1300_v42, 0.0  ;;  %v2817_v16 = vpop.f32.mrb[31].mxu1  ;;  %v1165_v25 = vld [vmem:[#allocation2 + $0x98] sm:$0xff]  ;;  %v1163_v35 = vld [vmem:[#allocation2 + $0x88] sm:$0xff] }
 0x123   : > { %v1396_v9 = vmax.f32 %v1332_v52, 0.0  ;;  %v1301_v10 = vadd.f32 %v2574_v6, %v1230_v58  ;;  %v1333_v17 = vadd.f32 %v2574_v6, %v1262_v46  ;;  %v1430_v61 = vmin.f32 %v1366_v47, 6.0  ;;  %v1197_v26 = vld [vmem:[#allocation2 + $0x198] sm:$0xff]  ;;  %v1195_v40 = vld [vmem:[#allocation2 + $0x188] sm:$0xff] }
 0x124   : > { %v1462_v62 = vmin.f32 %v1398_v48, 6.0  ;;  %v1367_v37 = vmax.f32 %v1303_v49, 0.0  ;;  %v1399_v38 = vmax.f32 %v1335_v50, 0.0  ;;  %v1428_v2 = vmin.f32 %v1364_v55, 6.0 }
 0x125   : > { %v1460_v3 = vmin.f32 %v1396_v9, 6.0  ;;  %v1365_v4 = vmax.f32 %v1301_v10, 0.0  ;;  %v1397_v5 = vmax.f32 %v1333_v17, 0.0  ;;  %v2043_v54 = vpack.c.bf16 %v1430_v61, %v1430_v61 }
 0x126   : > { %v2075_v63 = vpack.c.bf16 %v1462_v62, %v1462_v62  ;;  %v1431_v11 = vmin.f32 %v1367_v37, 6.0  ;;  %v1463_v12 = vmin.f32 %v1399_v38, 6.0  ;;  %v2041_v21 = vpack.c.bf16 %v1428_v2, %v1428_v2 }
 0x127   : > { %v2073_v22 = vpack.c.bf16 %v1460_v3, %v1460_v3  ;;  %v1429_v23 = vmin.f32 %v1365_v4, 6.0  ;;  %v1461_v24 = vmin.f32 %v1397_v5, 6.0  ;;  %1751 = vst.msk [vmem:[%s2613_s10 + $0x38] sm:$0xf] %vm1736_vm3, %v2043_v54  ;;  %v1235_v31 = vmul.f32 %v2569_v1, %v1164_v18 }
 0x128   : > { %1783 = vst.msk [vmem:[%s2613_s10 + $0xb8] sm:$0xf] %vm1736_vm3, %v2075_v63  ;;  %v2044_v29 = vpack.c.bf16 %v1431_v11, %v1431_v11  ;;  %v2076_v30 = vpack.c.bf16 %v1463_v12, %v1463_v12  ;;  %v1267_v32 = vmul.f32 %v2569_v1, %v1196_v56  ;;  %1749 = vst.msk [vmem:[%s2613_s10 + $0x30] sm:$0xf] %vm1736_vm3, %v2041_v21 }
 0x129   : > { %1781 = vst.msk [vmem:[%s2613_s10 + $0xb0] sm:$0xf] %vm1736_vm3, %v2073_v22  ;;  %v2042_v41 = vpack.c.bf16 %v1429_v23, %v1429_v23  ;;  %v2074_v51 = vpack.c.bf16 %v1461_v24, %v1461_v24  ;;  %v1233_v42 = vmul.f32 %v2569_v1, %v1162_v13  ;;  %v1265_v52 = vmul.f32 %v2569_v1, %v1194_v14  ;;  %v1168_v13 = vld [vmem:[#allocation2 + $0xb0] sm:$0xff] }
 0x12a   : > { %1752 = vst.msk [vmem:[%s2613_s10 + $0x3c] sm:$0xf] %vm1736_vm3, %v2044_v29  ;;  %1784 = vst.msk [vmem:[%s2613_s10 + $0xbc] sm:$0xf] %vm1736_vm3, %v2076_v30  ;;  %v1306_v58 = vadd.f32 %v2574_v6, %v1235_v31  ;;  %v1338_v46 = vadd.f32 %v2574_v6, %v1267_v32  ;;  %v1236_v47 = vmul.f32 %v2569_v1, %v1165_v25  ;;  %v1200_v14 = vld [vmem:[#allocation2 + $0x1b0] sm:$0xff]  ;;  %v1166_v25 = vld [vmem:[#allocation2 + $0xa0] sm:$0xff] }
 0x12b   : > { %v1268_v48 = vmul.f32 %v2569_v1, %v1197_v26  ;;  %1750 = vst.msk [vmem:[%s2613_s10 + $0x34] sm:$0xf] %vm1736_vm3, %v2042_v41  ;;  %1782 = vst.msk [vmem:[%s2613_s10 + $0xb4] sm:$0xf] %vm1736_vm3, %v2074_v51  ;;  %v1304_v49 = vadd.f32 %v2574_v6, %v1233_v42  ;;  %v1336_v50 = vadd.f32 %v2574_v6, %v1265_v52  ;;  %v1198_v26 = vld [vmem:[#allocation2 + $0x1a0] sm:$0xff] }
 0x12c   : > { %v1234_v55 = vmul.f32 %v2569_v1, %v1163_v35  ;;  %v1266_v9 = vmul.f32 %v2569_v1, %v1195_v40  ;;  %v1370_v10 = vmax.f32 %v1306_v58, 0.0  ;;  %v1402_v17 = vmax.f32 %v1338_v46, 0.0  ;;  %v339_v35 = vld [vmem:[#allocation2 + $0xb8] sm:$0xff]  ;;  %v337_v58 = vld [vmem:[#allocation2 + $0xa8] sm:$0xff] }
 0x12d   : > { %v1307_v18 = vadd.f32 %v2574_v6, %v1236_v47  ;;  %v1339_v56 = vadd.f32 %v2574_v6, %v1268_v48  ;;  %v1368_v61 = vmax.f32 %v1304_v49, 0.0  ;;  %v1400_v62 = vmax.f32 %v1336_v50, 0.0  ;;  %v371_v40 = vld [vmem:[#allocation2 + $0x1b8] sm:$0xff]  ;;  %v369_v46 = vld [vmem:[#allocation2 + $0x1a8] sm:$0xff] }
 0x12e   : > { %v1305_v37 = vadd.f32 %v2574_v6, %v1234_v55  ;;  %v1337_v38 = vadd.f32 %v2574_v6, %v1266_v9  ;;  %v1434_v2 = vmin.f32 %v1370_v10, 6.0  ;;  %v1466_v3 = vmin.f32 %v1402_v17, 6.0  ;;  %v342_v55 = vld [vmem:[#allocation2 + $0xd0] sm:$0xff] }
 0x12f   : > { %v1371_v4 = vmax.f32 %v1307_v18, 0.0  ;;  %v1403_v5 = vmax.f32 %v1339_v56, 0.0  ;;  %v1432_v54 = vmin.f32 %v1368_v61, 6.0  ;;  %v1464_v63 = vmin.f32 %v1400_v62, 6.0  ;;  %v374_v9 = vld [vmem:[#allocation2 + $0x1d0] sm:$0xff]  ;;  %v340_v61 = vld [vmem:[#allocation2 + $0xc0] sm:$0xff] }
 0x130   : > { %v1369_v11 = vmax.f32 %v1305_v37, 0.0  ;;  %v1401_v12 = vmax.f32 %v1337_v38, 0.0  ;;  %v2047_v21 = vpack.c.bf16 %v1434_v2, %v1434_v2  ;;  %v2079_v22 = vpack.c.bf16 %v1466_v3, %v1466_v3  ;;  %v372_v62 = vld [vmem:[#allocation2 + $0x1c0] sm:$0xff]  ;;  %v343_v3 = vld [vmem:[#allocation2 + $0xd8] sm:$0xff] }
 0x131   : > { %v1435_v23 = vmin.f32 %v1371_v4, 6.0  ;;  %v1467_v24 = vmin.f32 %v1403_v5, 6.0  ;;  %v2045_v29 = vpack.c.bf16 %v1432_v54, %v1432_v54  ;;  %v2077_v30 = vpack.c.bf16 %v1464_v63, %v1464_v63  ;;  %v375_v4 = vld [vmem:[#allocation2 + $0x1d8] sm:$0xff]  ;;  %v341_v63 = vld [vmem:[#allocation2 + $0xc8] sm:$0xff] }
 0x132   : > { %v1433_v31 = vmin.f32 %v1369_v11, 6.0  ;;  %v1465_v32 = vmin.f32 %v1401_v12, 6.0  ;;  %1755 = vst.msk [vmem:[%s2613_s10 + $0x48] sm:$0xf] %vm1736_vm3, %v2047_v21  ;;  %1787 = vst.msk [vmem:[%s2613_s10 + $0xc8] sm:$0xf] %vm1736_vm3, %v2079_v22  ;;  %v1239_v42 = vmul.f32 %v2569_v1, %v1168_v13  ;;  %v1271_v52 = vmul.f32 %v2569_v1, %v1200_v14 }
 0x133   : > { %v2048_v41 = vpack.c.bf16 %v1435_v23, %v1435_v23  ;;  %v2080_v51 = vpack.c.bf16 %v1467_v24, %v1467_v24  ;;  %1753 = vst.msk [vmem:[%s2613_s10 + $0x40] sm:$0xf] %vm1736_vm3, %v2045_v29  ;;  %1785 = vst.msk [vmem:[%s2613_s10 + $0xc0] sm:$0xf] %vm1736_vm3, %v2077_v30  ;;  %v1237_v49 = vmul.f32 %v2569_v1, %v1166_v25  ;;  %v373_v11 = vld [vmem:[#allocation2 + $0x1c8] sm:$0xff]  ;;  %v346_v13 = vld [vmem:[#allocation2 + $0xf0] sm:$0xff] }
 0x134   : > { %v2046_v47 = vpack.c.bf16 %v1433_v31, %v1433_v31  ;;  %v2078_v48 = vpack.c.bf16 %v1465_v32, %v1465_v32  ;;  %v1269_v50 = vmul.f32 %v2569_v1, %v1198_v26  ;;  %v1310_v10 = vadd.f32 %v2574_v6, %v1239_v42  ;;  %v378_v14 = vld [vmem:[#allocation2 + $0x1f0] sm:$0xff]  ;;  %v344_v23 = vld [vmem:[#allocation2 + $0xe0] sm:$0xff]  ;;  %v347_v25 = vld [vmem:[#allocation2 + $0xf8] sm:$0xff] }
 0x135   : > { %1756 = vst.msk [vmem:[%s2613_s10 + $0x4c] sm:$0xf] %vm1736_vm3, %v2048_v41  ;;  %1788 = vst.msk [vmem:[%s2613_s10 + $0xcc] sm:$0xf] %vm1736_vm3, %v2080_v51  ;;  %v1342_v17 = vadd.f32 %v2574_v6, %v1271_v52  ;;  %v1037_v18 = vadd.f32 %v2731_v36, %v339_v35  ;;  %v1069_v56 = vadd.f32 %v2733_v39, %v371_v40  ;;  %v376_v24 = vld [vmem:[#allocation2 + $0x1e0] sm:$0xff]  ;;  %v379_v30 = vld [vmem:[#allocation2 + $0x1f8] sm:$0xff] }
 0x136   : > { %1754 = vst.msk [vmem:[%s2613_s10 + $0x44] sm:$0xf] %vm1736_vm3, %v2046_v47  ;;  %1786 = vst.msk [vmem:[%s2613_s10 + $0xc4] sm:$0xf] %vm1736_vm3, %v2078_v48  ;;  %v1308_v1 = vadd.f32 %v2574_v6, %v1237_v49  ;;  %v1340_v37 = vadd.f32 %v2574_v6, %v1269_v50  ;;  %v1035_v38 = vadd.f32 %v2741_v45, %v337_v58  ;;  %v1374_v5 = vmax.f32 %v1310_v10, 0.0  ;;  %v345_v31 = vld [vmem:[#allocation2 + $0xe8] sm:$0xff] }
 0x137   : > { %v1067_v2 = vadd.f32 %v2743_v57, %v369_v46  ;;  %v1406_v36 = vmax.f32 %v1342_v17, 0.0  ;;  %1102 = vst.msk [vmem:[#allocation2 + $0xb8] sm:$0xff] %vm251_vm0, %v1037_v18  ;;  %1134 = vst.msk [vmem:[#allocation2 + $0x1b8] sm:$0xff] %vm251_vm0, %v1069_v56  ;;  %v1040_v39 = vadd.f32 %v2755_v0, %v342_v55  ;;  %v1072_v54 = vadd.f32 %v2757_v8, %v374_v9  ;;  %v2935_v50 = vld [vmem:[%s3025_s3] ss:$0 sm:$0xff] }
 0x138   : > { %v1372_v12 = vmax.f32 %v1308_v1, 0.0  ;;  %v1404_v6 = vmax.f32 %v1340_v37, 0.0  ;;  %1100 = vst.msk [vmem:[#allocation2 + $0xa8] sm:$0xff] %vm251_vm0, %v1035_v38  ;;  %v1038_v45 = vadd.f32 %v2759_v19, %v340_v61  ;;  %v1070_v57 = vadd.f32 %v2761_v20, %v372_v62 }
 0x139   : > { %1132 = vst.msk [vmem:[#allocation2 + $0x1a8] sm:$0xff] %vm251_vm0, %v1067_v2  ;;  %v1438_v21 = vmin.f32 %v1374_v5, 6.0  ;;  %v1470_v22 = vmin.f32 %v1406_v36, 6.0  ;;  %1105 = vst.msk [vmem:[#allocation2 + $0xd0] sm:$0xff] %vm251_vm0, %v1040_v39  ;;  %v1041_v0 = vadd.f32 %v2769_v27, %v343_v3  ;;  %v1073_v8 = vadd.f32 %v2771_v28, %v375_v4  ;;  %v377_v27 = vld [vmem:[#allocation2 + $0x1e8] sm:$0xff] }
 0x13a   : > { %1137 = vst.msk [vmem:[#allocation2 + $0x1d0] sm:$0xff] %vm251_vm0, %v1072_v54  ;;  %v1436_v26 = vmin.f32 %v1372_v12, 6.0  ;;  %v1468_v29 = vmin.f32 %v1404_v6, 6.0  ;;  %1103 = vst.msk [vmem:[#allocation2 + $0xc0] sm:$0xff] %vm251_vm0, %v1038_v45  ;;  %v1039_v19 = vadd.f32 %v2779_v33, %v341_v63  ;;  %v1071_v20 = vadd.f32 %v2781_v34, %v373_v11 }
 0x13b   : > { %1135 = vst.msk [vmem:[#allocation2 + $0x1c0] sm:$0xff] %vm251_vm0, %v1070_v57  ;;  %v2051_v32 = vpack.c.bf16 %v1438_v21, %v1438_v21  ;;  %v2083_v28 = vpack.c.bf16 %v1470_v22, %v1470_v22  ;;  %1106 = vst.msk [vmem:[#allocation2 + $0xd8] sm:$0xff] %vm251_vm0, %v1041_v0  ;;  %v1044_v35 = vadd.f32 %v2803_v59, %v346_v13 }
 0x13c   : > { %1138 = vst.msk [vmem:[#allocation2 + $0x1d8] sm:$0xff] %vm251_vm0, %v1073_v8  ;;  %v1076_v40 = vadd.f32 %v2805_v60, %v378_v14  ;;  %v2049_v33 = vpack.c.bf16 %v1436_v26, %v1436_v26  ;;  %v2081_v41 = vpack.c.bf16 %v1468_v29, %v1468_v29  ;;  %1104 = vst.msk [vmem:[#allocation2 + $0xc8] sm:$0xff] %vm251_vm0, %v1039_v19 }
 0x13d   : > { %1136 = vst.msk [vmem:[#allocation2 + $0x1c8] sm:$0xff] %vm251_vm0, %v1071_v20  ;;  %v1042_v34 = vadd.f32 %v2807_v43, %v344_v23  ;;  %v1074_v51 = vadd.f32 %v2809_v44, %v376_v24  ;;  %1109 = vst.msk [vmem:[#allocation2 + $0xf0] sm:$0xff] %vm251_vm0, %v1044_v35  ;;  %v1045_v59 = vadd.f32 %v2811_v7, %v347_v25  ;;  %v2922_v7 = vld [vmem:[%s3024_s2] ss:$0 sm:$0xff] }
 0x13e   : > { %1759 = vst.msk [vmem:[%s2613_s10 + $0x58] sm:$0xf] %vm1736_vm3, %v2051_v32  ;;  %1791 = vst.msk [vmem:[%s2613_s10 + $0xd8] sm:$0xf] %vm1736_vm3, %v2083_v28  ;;  %v1077_v60 = vadd.f32 %v2813_v53, %v379_v30  ;;  %v1043_v42 = vadd.f32 %v2815_v15, %v345_v31  ;;  %v1075_v52 = vadd.f32 %v2817_v16, %v377_v27  ;;  %v1169_v43 = vld [vmem:[#allocation2 + $0xb8] sm:$0xff] }
 0x13f   : > { %1141 = vst.msk [vmem:[#allocation2 + $0x1f0] sm:$0xff] %vm251_vm0, %v1076_v40  ;;  %v1201_v44 = vld [vmem:[#allocation2 + $0x1b8] sm:$0xff]  ;;  %1107 = vst.msk [vmem:[#allocation2 + $0xe0] sm:$0xff] %vm251_vm0, %v1042_v34  ;;  %v1240_v53 = vmul.f32 %v2922_v7, %v1169_v43  ;;  %v1167_v16 = vld [vmem:[#allocation2 + $0xa8] sm:$0xff] }
 0x140   : > { %1757 = vst.msk [vmem:[%s2613_s10 + $0x50] sm:$0xf] %vm1736_vm3, %v2049_v33  ;;  %1789 = vst.msk [vmem:[%s2613_s10 + $0xd0] sm:$0xf] %vm1736_vm3, %v2081_v41  ;;  %v1272_v15 = vmul.f32 %v2922_v7, %v1201_v44  ;;  %v1199_v58 = vld [vmem:[#allocation2 + $0x1a8] sm:$0xff]  ;;  %v1238_v46 = vmul.f32 %v2922_v7, %v1167_v16  ;;  %v1172_v48 = vld [vmem:[#allocation2 + $0xd0] sm:$0xff] }
 0x141   : > { %1139 = vst.msk [vmem:[#allocation2 + $0x1e0] sm:$0xff] %vm251_vm0, %v1074_v51  ;;  %1110 = vst.msk [vmem:[#allocation2 + $0xf8] sm:$0xff] %vm251_vm0, %v1045_v59  ;;  %v1270_v47 = vmul.f32 %v2922_v7, %v1199_v58  ;;  %v1204_v49 = vld [vmem:[#allocation2 + $0x1d0] sm:$0xff]  ;;  %v1311_v55 = vadd.f32 %v2935_v50, %v1240_v53  ;;  %v1243_v10 = vmul.f32 %v2922_v7, %v1172_v48  ;;  %v1170_v18 = vld [vmem:[#allocation2 + $0xc0] sm:$0xff] }
 0x142   : > { %1142 = vst.msk [vmem:[#allocation2 + $0x1f8] sm:$0xff] %vm251_vm0, %v1077_v60  ;;  %1108 = vst.msk [vmem:[#allocation2 + $0xe8] sm:$0xff] %vm251_vm0, %v1043_v42  ;;  %v1343_v9 = vadd.f32 %v2935_v50, %v1272_v15  ;;  %v1275_v17 = vmul.f32 %v2922_v7, %v1204_v49  ;;  %v1202_v56 = vld [vmem:[#allocation2 + $0x1c0] sm:$0xff]  ;;  %v1309_v61 = vadd.f32 %v2935_v50, %v1238_v46  ;;  %v1173_v21 = vld [vmem:[#allocation2 + $0xd8] sm:$0xff] }
 0x143   : > { %1140 = vst.msk [vmem:[#allocation2 + $0x1e8] sm:$0xff] %vm251_vm0, %v1075_v52  ;;  %v1341_v62 = vadd.f32 %v2935_v50, %v1270_v47  ;;  %v1241_v1 = vmul.f32 %v2922_v7, %v1170_v18  ;;  %v1273_v37 = vmul.f32 %v2922_v7, %v1202_v56  ;;  %v1375_v38 = vmax.f32 %v1311_v55, 0.0  ;;  %v1205_v22 = vld [vmem:[#allocation2 + $0x1d8] sm:$0xff]  ;;  %v1171_v25 = vld [vmem:[#allocation2 + $0xc8] sm:$0xff] }
 0x144   : > { %v1407_v2 = vmax.f32 %v1343_v9, 0.0  ;;  %v1314_v3 = vadd.f32 %v2935_v50, %v1243_v10  ;;  %v1346_v4 = vadd.f32 %v2935_v50, %v1275_v17  ;;  %v1373_v5 = vmax.f32 %v1309_v61, 0.0  ;;  %v1203_v26 = vld [vmem:[#allocation2 + $0x1c8] sm:$0xff]  ;;  %v1176_v31 = vld [vmem:[#allocation2 + $0xf0] sm:$0xff] }
 0x145   : > { %v1405_v36 = vmax.f32 %v1341_v62, 0.0  ;;  %v1312_v39 = vadd.f32 %v2935_v50, %v1241_v1  ;;  %v1344_v54 = vadd.f32 %v2935_v50, %v1273_v37  ;;  %v1439_v63 = vmin.f32 %v1375_v38, 6.0 }
 0x146   : > { %v1471_v11 = vmin.f32 %v1407_v2, 6.0  ;;  %v1378_v12 = vmax.f32 %v1314_v3, 0.0  ;;  %v1410_v6 = vmax.f32 %v1346_v4, 0.0  ;;  %v1437_v45 = vmin.f32 %v1373_v5, 6.0  ;;  %v1208_v27 = vld [vmem:[#allocation2 + $0x1f0] sm:$0xff]  ;;  %v1174_v33 = vld [vmem:[#allocation2 + $0xe0] sm:$0xff] }
 0x147   : > { %v1469_v57 = vmin.f32 %v1405_v36, 6.0  ;;  %v1376_v13 = vmax.f32 %v1312_v39, 0.0  ;;  %v1408_v14 = vmax.f32 %v1344_v54, 0.0  ;;  %v2052_v0 = vpack.c.bf16 %v1439_v63, %v1439_v63 }
 0x148   : > { %v2084_v8 = vpack.c.bf16 %v1471_v11, %v1471_v11  ;;  %v1442_v23 = vmin.f32 %v1378_v12, 6.0  ;;  %v1474_v24 = vmin.f32 %v1410_v6, 6.0  ;;  %v2050_v29 = vpack.c.bf16 %v1437_v45, %v1437_v45  ;;  %v1206_v41 = vld [vmem:[#allocation2 + $0x1e0] sm:$0xff]  ;;  %v1177_v3 = vld [vmem:[#allocation2 + $0xf8] sm:$0xff] }
 0x149   : > { %v2082_v19 = vpack.c.bf16 %v1469_v57, %v1469_v57  ;;  %v1440_v20 = vmin.f32 %v1376_v13, 6.0  ;;  %v1472_v30 = vmin.f32 %v1408_v14, 6.0  ;;  %1760 = vst.msk [vmem:[%s2613_s10 + $0x5c] sm:$0xf] %vm1736_vm3, %v2052_v0  ;;  %v1244_v35 = vmul.f32 %v2922_v7, %v1173_v21  ;;  %v1209_v4 = vld [vmem:[#allocation2 + $0x1f8] sm:$0xff]  ;;  %v1175_v63 = vld [vmem:[#allocation2 + $0xe8] sm:$0xff] }
 0x14a   : > { %1792 = vst.msk [vmem:[%s2613_s10 + $0xdc] sm:$0xf] %vm1736_vm3, %v2084_v8  ;;  %v2055_v32 = vpack.c.bf16 %v1442_v23, %v1442_v23  ;;  %v2087_v28 = vpack.c.bf16 %v1474_v24, %v1474_v24  ;;  %v1276_v40 = vmul.f32 %v2922_v7, %v1205_v22  ;;  %1758 = vst.msk [vmem:[%s2613_s10 + $0x54] sm:$0xf] %vm1736_vm3, %v2050_v29  ;;  %v1207_v11 = vld [vmem:[#allocation2 + $0x1e8] sm:$0xff] }
 0x14b   : > { %1790 = vst.msk [vmem:[%s2613_s10 + $0xd4] sm:$0xf] %vm1736_vm3, %v2082_v19  ;;  %v2053_v34 = vpack.c.bf16 %v1440_v20, %v1440_v20  ;;  %v2085_v51 = vpack.c.bf16 %v1472_v30, %v1472_v30  ;;  %v1242_v59 = vmul.f32 %v2922_v7, %v1171_v25  ;;  %v1274_v60 = vmul.f32 %v2922_v7, %v1203_v26 }
 0x14c   : > { %1763 = vst.msk [vmem:[%s2613_s10 + $0x68] sm:$0xf] %vm1736_vm3, %v2055_v32  ;;  %1795 = vst.msk [vmem:[%s2613_s10 + $0xe8] sm:$0xf] %vm1736_vm3, %v2087_v28  ;;  %v1315_v42 = vadd.f32 %v2935_v50, %v1244_v35  ;;  %v1347_v52 = vadd.f32 %v2935_v50, %v1276_v40  ;;  %v1247_v43 = vmul.f32 %v2922_v7, %v1176_v31 }
 0x14d   : > { %v1279_v44 = vmul.f32 %v2922_v7, %v1208_v27  ;;  %1761 = vst.msk [vmem:[%s2613_s10 + $0x60] sm:$0xf] %vm1736_vm3, %v2053_v34  ;;  %1793 = vst.msk [vmem:[%s2613_s10 + $0xe0] sm:$0xf] %vm1736_vm3, %v2085_v51  ;;  %v1313_v53 = vadd.f32 %v2935_v50, %v1242_v59  ;;  %v1345_v15 = vadd.f32 %v2935_v50, %v1274_v60 }
 0x14e   : > { %v1245_v16 = vmul.f32 %v2922_v7, %v1174_v33  ;;  %v1277_v58 = vmul.f32 %v2922_v7, %v1206_v41  ;;  %v1379_v46 = vmax.f32 %v1315_v42, 0.0  ;;  %v1411_v47 = vmax.f32 %v1347_v52, 0.0 }
 0x14f   : > { %v1318_v48 = vadd.f32 %v2935_v50, %v1247_v43  ;;  %v1350_v49 = vadd.f32 %v2935_v50, %v1279_v44  ;;  %v1377_v55 = vmax.f32 %v1313_v53, 0.0  ;;  %v1409_v9 = vmax.f32 %v1345_v15, 0.0 }
 0x150   : > { %v1316_v10 = vadd.f32 %v2935_v50, %v1245_v16  ;;  %v1348_v17 = vadd.f32 %v2935_v50, %v1277_v58  ;;  %v1443_v18 = vmin.f32 %v1379_v46, 6.0  ;;  %v1475_v56 = vmin.f32 %v1411_v47, 6.0 }
 0x151   : > { %v1382_v61 = vmax.f32 %v1318_v48, 0.0  ;;  %v1414_v62 = vmax.f32 %v1350_v49, 0.0  ;;  %v1441_v1 = vmin.f32 %v1377_v55, 6.0  ;;  %v1473_v37 = vmin.f32 %v1409_v9, 6.0 }
 0x152   : > { %v1380_v38 = vmax.f32 %v1316_v10, 0.0  ;;  %v1412_v2 = vmax.f32 %v1348_v17, 0.0  ;;  %v2056_v5 = vpack.c.bf16 %v1443_v18, %v1443_v18  ;;  %v2088_v36 = vpack.c.bf16 %v1475_v56, %v1475_v56 }
 0x153   : > { %v1446_v39 = vmin.f32 %v1382_v61, 6.0  ;;  %v1478_v54 = vmin.f32 %v1414_v62, 6.0  ;;  %v2054_v12 = vpack.c.bf16 %v1441_v1, %v1441_v1  ;;  %v2086_v6 = vpack.c.bf16 %v1473_v37, %v1473_v37 }
 0x154   : > { %v1444_v45 = vmin.f32 %v1380_v38, 6.0  ;;  %v1476_v57 = vmin.f32 %v1412_v2, 6.0  ;;  %1764 = vst.msk [vmem:[%s2613_s10 + $0x6c] sm:$0xf] %vm1736_vm3, %v2056_v5  ;;  %1796 = vst.msk [vmem:[%s2613_s10 + $0xec] sm:$0xf] %vm1736_vm3, %v2088_v36  ;;  %v1248_v21 = vmul.f32 %v2922_v7, %v1177_v3  ;;  %v1280_v22 = vmul.f32 %v2922_v7, %v1209_v4 }
 0x155   : > { %v2059_v13 = vpack.c.bf16 %v1446_v39, %v1446_v39  ;;  %v2091_v14 = vpack.c.bf16 %v1478_v54, %v1478_v54  ;;  %1762 = vst.msk [vmem:[%s2613_s10 + $0x64] sm:$0xf] %vm1736_vm3, %v2054_v12  ;;  %1794 = vst.msk [vmem:[%s2613_s10 + $0xe4] sm:$0xf] %vm1736_vm3, %v2086_v6  ;;  %v1246_v23 = vmul.f32 %v2922_v7, %v1175_v63 }
 0x156   : > { %v2057_v0 = vpack.c.bf16 %v1444_v45, %v1444_v45  ;;  %v2089_v8 = vpack.c.bf16 %v1476_v57, %v1476_v57  ;;  %v1278_v24 = vmul.f32 %v2922_v7, %v1207_v11  ;;  %v1319_v25 = vadd.f32 %v2935_v50, %v1248_v21 }
 0x157   : > { %1767 = vst.msk [vmem:[%s2613_s10 + $0x78] sm:$0xf] %vm1736_vm3, %v2059_v13  ;;  %1799 = vst.msk [vmem:[%s2613_s10 + $0xf8] sm:$0xf] %vm1736_vm3, %v2091_v14  ;;  %v1351_v26 = vadd.f32 %v2935_v50, %v1280_v22  ;;  %v1317_v29 = vadd.f32 %v2935_v50, %v1246_v23 }
 0x158   : > { %1765 = vst.msk [vmem:[%s2613_s10 + $0x70] sm:$0xf] %vm1736_vm3, %v2057_v0  ;;  %1797 = vst.msk [vmem:[%s2613_s10 + $0xf0] sm:$0xf] %vm1736_vm3, %v2089_v8  ;;  %v1349_v19 = vadd.f32 %v2935_v50, %v1278_v24  ;;  %v1383_v7 = vmax.f32 %v1319_v25, 0.0 }
 0x159   : > { %v1415_v20 = vmax.f32 %v1351_v26, 0.0  ;;  %v1381_v30 = vmax.f32 %v1317_v29, 0.0 }
 0x15a   : > { %v1413_v31 = vmax.f32 %v1349_v19, 0.0  ;;  %v1447_v27 = vmin.f32 %v1383_v7, 6.0 }
 0x15b   : > { %v1479_v32 = vmin.f32 %v1415_v20, 6.0  ;;  %v1445_v28 = vmin.f32 %v1381_v30, 6.0 }
 0x15c   : > { %v1477_v35 = vmin.f32 %v1413_v31, 6.0  ;;  %v2060_v40 = vpack.c.bf16 %v1447_v27, %v1447_v27 }
 0x15d   : > { %v2092_v33 = vpack.c.bf16 %v1479_v32, %v1479_v32  ;;  %v2058_v41 = vpack.c.bf16 %v1445_v28, %v1445_v28 }
 0x15e   : > { %v2090_v34 = vpack.c.bf16 %v1477_v35, %v1477_v35  ;;  %1768 = vst.msk [vmem:[%s2613_s10 + $0x7c] sm:$0xf] %vm1736_vm3, %v2060_v40 }
 0x15f   : > { %1800 = vst.msk [vmem:[%s2613_s10 + $0xfc] sm:$0xf] %vm1736_vm3, %v2092_v33  ;;  %1766 = vst.msk [vmem:[%s2613_s10 + $0x74] sm:$0xf] %vm1736_vm3, %v2058_v41 }
 0x160   : > { %1798 = vst.msk [vmem:[%s2613_s10 + $0xf4] sm:$0xf] %vm1736_vm3, %v2090_v34 }
 0x161 PF: > { %s14_s17 = sadd.s32 1, %s2290_s17   ;;  %s3027_s15 = smov %s2286_s16 }
 0x162   : > { %p11_p5 = scmp.ge.s32.totalorder %s14_s17, 6   ;;  %s3028_s16 = smov %s3030_s18 }
 0x164   :  { %13 = sbr.rel (!%p11_p5) target bundleno = 2 (0x2), region = 77 }

</bundles_post_ra>
